<compile_context>
chip_gen: v7x
topology: tpu7x:2x2x1
jax: 0.10.0
libtpu: 0.0.40
codegen_flags: <defaults>
</compile_context>

<pallas_src>
import math
import functools

import numpy as np
import jax
import jax.numpy as jnp
from jax import lax
from jax.experimental import pallas as pl
from jax.experimental.pallas import tpu as pltpu


# ----------------------------------------------------------------------------
# Static helper matrices (built once at trace time with numpy)
# ----------------------------------------------------------------------------

def adaptive_pool_matrix(h, w, ps):
    """(ps*ps, h*w) matrix reproducing nn.AdaptiveAvgPool2d((ps, ps)) exactly."""
    n = h * w
    P = np.zeros((ps * ps, n), np.float32)
    for oi in range(ps):
        i0 = (oi * h) // ps
        i1 = -(-((oi + 1) * h) // ps)          # ceil
        for oj in range(ps):
            j0 = (oj * w) // ps
            j1 = -(-((oj + 1) * w) // ps)
            cnt = float((i1 - i0) * (j1 - j0))
            for i in range(i0, i1):
                for j in range(j0, j1):
                    P[oi * ps + oj, i * w + j] = 1.0 / cnt
    return P


def dwconv_shift_matrix(h, w):
    """(9*n, n) stacked 0/1 shift matrices (tap-major).  Row block t gathers
    the (di, dj) shifted neighbour of every token (0 in the zero-padding)."""
    n = h * w
    S = np.zeros((9, n, n), np.float32)
    for di in (-1, 0, 1):
        for dj in (-1, 0, 1):
            t = (di + 1) * 3 + (dj + 1)
            for i in range(h):
                for j in range(w):
                    si, sj = i + di, j + dj
                    if 0 <= si < h and 0 <= sj < w:
                        S[t, i * w + j, si * w + sj] = 1.0
    return S.reshape(9 * n, n)


def head_block_mask(num_heads, fused_num, dim):
    """(H*F, c) 0/1 mask: row h*F+f keeps only head-h's channel block."""
    d = dim // num_heads
    M = np.zeros((num_heads * fused_num, dim), np.float32)
    for hh in range(num_heads):
        M[hh * fused_num:(hh + 1) * fused_num, hh * d:(hh + 1) * d] = 1.0
    return M


def head_group_sum_matrix(num_heads, fused_num):
    """(H*F, H*F) block-diagonal ones: e @ G gives per-head group sums."""
    HF = num_heads * fused_num
    G = np.zeros((HF, HF), np.float32)
    for hh in range(num_heads):
        G[hh * fused_num:(hh + 1) * fused_num,
          hh * fused_num:(hh + 1) * fused_num] = 1.0
    return G


# ----------------------------------------------------------------------------
# JAX glue: bilinear interpolation matching F.interpolate(align_corners=False)
# ----------------------------------------------------------------------------

def _resize_coords(out_size, in_size):
    scale = in_size / out_size
    o = jnp.arange(out_size, dtype=jnp.float32)
    src = (o + 0.5) * scale - 0.5
    src = jnp.maximum(src, 0.0)
    i0 = jnp.clip(jnp.floor(src).astype(jnp.int32), 0, in_size - 1)
    i1 = jnp.clip(i0 + 1, 0, in_size - 1)
    w1 = src - i0.astype(jnp.float32)
    return i0, i1, w1


def bilinear_resize(x, out_h, out_w):
    """x: (..., H, W) -> (..., out_h, out_w); PyTorch bilinear, align_corners=False."""
    in_h, in_w = x.shape[-2], x.shape[-1]
    i0, i1, wh = _resize_coords(out_h, in_h)
    j0, j1, ww = _resize_coords(out_w, in_w)
    top = x[..., i0, :]
    bot = x[..., i1, :]
    rows = top * (1.0 - wh)[:, None] + bot * wh[:, None]
    left = rows[..., :, j0]
    right = rows[..., :, j1]
    return left * (1.0 - ww) + right * ww


# ----------------------------------------------------------------------------
# Fused Pallas kernel: qkv -> pool -> two-stage attention -> dwconv -> proj
# ----------------------------------------------------------------------------

def _fused_attention_kernel(x_ref, wqkv_ref, poolh_ref, mask_ref, pb_ref,
                            fb_ref, gsum_ref, shift_ref, w9_ref, dwcb_ref,
                            projw_ref, projb_ref, o_ref, *,
                            n_tok, batch_per_block):
    # Shapes (per grid step):
    #   x: (bb*n, c)   wqkv: (c, 3c)   poolh: (HF, n)   mask: (HF, c)
    #   pb: (HF, n)    fb: (n, HF)     gsum: (HF, HF)   shift: (9n, n)
    #   w9: (9, c)     dwcb/projb: (1, c)               projw: (c, c)
    c = x_ref.shape[-1]
    x = x_ref[...]

    # One fused qkv matmul over all folded batch rows (qkv_bias=False).
    qkv = jnp.dot(x, wqkv_ref[...], preferred_element_type=jnp.float32)  # (bb*n, 3c)
    q = qkv[:, :c]
    k = qkv[:, c:2 * c]
    v = qkv[:, 2 * c:]

    poolh = poolh_ref[...]     # pooling matrix, tiled per head, pre-scaled
    mask = mask_ref[...]       # per-head channel-block mask
    pb = pb_ref[...]
    fb = fb_ref[...]
    gsum = gsum_ref[...]
    shift = shift_ref[...]
    w9 = w9_ref[...]

    dn = (((1,), (1,)), ((), ()))   # contract last axis of both operands
    parts = []
    for j in range(batch_per_block):
        r0 = j * n_tok
        q_b = q[r0:r0 + n_tok]          # (n, c)
        k_b = k[r0:r0 + n_tok]
        v_b = v[r0:r0 + n_tok]

        # Fused tokens for ALL heads: row h*F+f = head-h's pooled query,
        # masked to head-h's channel block, already multiplied by the softmax
        # scale (folded into poolh in the wrapper).
        ft = jnp.dot(poolh, q_b, preferred_element_type=jnp.float32) * mask   # (HF, c)

        # Stage 1: fused tokens attend to all keys (softmax over n, exact).
        s1 = lax.dot_general(ft, k_b, dn,
                             preferred_element_type=jnp.float32) + pb        # (HF, n)
        s1 = s1 - jnp.max(s1, axis=-1, keepdims=True)
        e1 = jnp.exp(s1)
        a1 = e1 / jnp.sum(e1, axis=-1, keepdims=True)
        fv = jnp.dot(a1, v_b, preferred_element_type=jnp.float32) * mask      # (HF, c)

        # Stage 2: queries attend to fused tokens.  Per-head softmax over the
        # F columns of each head group: shared row max (shift-invariant) +
        # block-diagonal group-sum matmul for the denominators.
        s2 = lax.dot_general(q_b, ft, dn,
                             preferred_element_type=jnp.float32) + fb         # (n, HF)
        e2 = jnp.exp(s2 - jnp.max(s2, axis=-1, keepdims=True))
        den = jnp.dot(e2, gsum, preferred_element_type=jnp.float32)           # (n, HF)
        a2 = e2 / den
        attn = jnp.dot(a2, fv, preferred_element_type=jnp.float32)            # (n, c)

        # Depthwise 3x3 conv on v: ONE (9n, n) x (n, c) matmul, then per-tap
        # channel weighting (w9 loaded once above).
        shifted = jnp.dot(shift, v_b, preferred_element_type=jnp.float32)     # (9n, c)
        dwc = shifted[0:n_tok] * w9[0:1]
        for t in range(1, 9):
            dwc = dwc + shifted[t * n_tok:(t + 1) * n_tok] * w9[t:t + 1]

        parts.append(attn + dwc)

    y = jnp.concatenate(parts, axis=0) if batch_per_block > 1 else parts[0]
    y = y + dwcb_ref[...]

    # Output projection over all folded rows.
    o_ref[...] = (jnp.dot(y, projw_ref[...], preferred_element_type=jnp.float32)
                  + projb_ref[...])


# ----------------------------------------------------------------------------
# FusedAttention forward (eval mode: dropouts are identity)
# ----------------------------------------------------------------------------

def make_params(key, dim, num_heads, fused_num, window):
    ks = jax.random.split(key, 12)
    std = 0.02
    p = {
        "qkv_w":   jax.random.normal(ks[0], (dim, 3 * dim), jnp.float32) * std,
        "proj_w":  jax.random.normal(ks[1], (dim, dim), jnp.float32) * std,
        "proj_b":  jax.random.normal(ks[2], (dim,), jnp.float32) * std,
        "dwc_w":   jax.random.normal(ks[3], (dim, 1, 3, 3), jnp.float32) * std,
        "dwc_b":   jax.random.normal(ks[4], (dim,), jnp.float32) * std,
        "an_bias": jax.random.normal(ks[5], (num_heads, fused_num, 7, 7), jnp.float32) * std,
        "na_bias": jax.random.normal(ks[6], (num_heads, fused_num, 7, 7), jnp.float32) * std,
        "ah_bias": jax.random.normal(ks[7], (1, num_heads, fused_num, window, 1), jnp.float32) * std,
        "aw_bias": jax.random.normal(ks[8], (1, num_heads, fused_num, 1, window), jnp.float32) * std,
        "ha_bias": jax.random.normal(ks[9], (1, num_heads, window, 1, fused_num), jnp.float32) * std,
        "wa_bias": jax.random.normal(ks[10], (1, num_heads, 1, window, fused_num), jnp.float32) * std,
        "ca_bias": jax.random.normal(ks[11], (1, num_heads, 1, fused_num), jnp.float32) * std,
        # NOTE: ac_bias exists in the PyTorch module but is unused in forward.
    }
    return p


def fused_attention_forward(x, params, *, num_heads, fused_num, window,
                            num_batch_blocks=None):
    b, n, c = x.shape
    h = w = math.floor(n ** 0.5)
    assert h * w == n, "non-square n path not supported"
    # TODO(synk): h*w != n branch (torch.randint token subsampling) skipped.

    H, F = num_heads, fused_num
    d = c // H
    ps = int(F ** 0.5)
    scale = d ** (-0.5)

    # Batch folding: default to a single grid step (best on single-TC
    # v5e/v6e); use 2 parallel blocks when the batch is large and even so
    # both v7x TensorCores stay busy.
    if num_batch_blocks is None:
        num_batch_blocks = 2 if (b > 2 and b % 2 == 0) else 1
    assert b % num_batch_blocks == 0
    bb = b // num_batch_blocks

    # --- relative-position biases (tiny parameter-shaped glue, plain JAX) ---
    # stage-1 bias (fused tokens -> keys), batch independent: (H*F, n)
    pb1 = bilinear_resize(params["an_bias"], window, window).reshape(1, H, F, window * window)
    pb2 = (params["ah_bias"] + params["aw_bias"]).reshape(1, H, F, window * window)
    pb = bilinear_resize(pb1 + pb2, F, n)[0].reshape(H * F, n)

    # stage-2 bias (queries -> fused tokens), batch independent: (n, H*F)
    fb1 = bilinear_resize(params["na_bias"], window, window)
    fb1 = fb1.reshape(1, H, F, window * window).transpose(0, 1, 3, 2)
    fb2 = (params["ha_bias"] + params["wa_bias"]).reshape(1, H, window * window, F)
    fb = jnp.concatenate([params["ca_bias"], fb1 + fb2], axis=2)      # (1,H,ww+1,F)
    fb = bilinear_resize(fb, n, F)[0]                                 # (H, n, F)
    fb = jnp.transpose(fb, (1, 0, 2)).reshape(n, H * F)

    # --- static MXU-friendly helper matrices ---
    poolh = (np.tile(adaptive_pool_matrix(h, w, ps), (H, 1)) * scale).astype(np.float32)
    mask = head_block_mask(H, F, c)                                   # (HF, c)
    gsum = head_group_sum_matrix(H, F)                                # (HF, HF)
    shift = dwconv_shift_matrix(h, w)                                 # (9n, n)

    w9 = params["dwc_w"].reshape(c, 9).T                              # (9, c)
    dwc_b = params["dwc_b"].reshape(1, c)
    proj_b = params["proj_b"].reshape(1, c)

    x_blocks = x.reshape(num_batch_blocks, bb * n, c)

    kernel = functools.partial(_fused_attention_kernel,
                               n_tok=n, batch_per_block=bb)

    out = pl.pallas_call(
        kernel,
        out_shape=jax.ShapeDtypeStruct((num_batch_blocks, bb * n, c), jnp.float32),
        grid=(num_batch_blocks,),
        in_specs=[
            pl.BlockSpec((None, bb * n, c), lambda i: (i, 0, 0)),     # x (folded batch)
            pl.BlockSpec((c, 3 * c), lambda i: (0, 0)),               # qkv weight
            pl.BlockSpec((H * F, n), lambda i: (0, 0)),               # pooling (pre-scaled)
            pl.BlockSpec((H * F, c), lambda i: (0, 0)),               # head block mask
            pl.BlockSpec((H * F, n), lambda i: (0, 0)),               # stage-1 bias
            pl.BlockSpec((n, H * F), lambda i: (0, 0)),               # stage-2 bias
            pl.BlockSpec((H * F, H * F), lambda i: (0, 0)),           # per-head group sums
            pl.BlockSpec((9 * n, n), lambda i: (0, 0)),               # dwconv shift matrix
            pl.BlockSpec((9, c), lambda i: (0, 0)),                   # dwconv taps
            pl.BlockSpec((1, c), lambda i: (0, 0)),                   # dwconv bias
            pl.BlockSpec((c, c), lambda i: (0, 0)),                   # proj weight
            pl.BlockSpec((1, c), lambda i: (0, 0)),                   # proj bias
        ],
        out_specs=pl.BlockSpec((None, bb * n, c), lambda i: (i, 0, 0)),
        compiler_params=pltpu.CompilerParams(dimension_semantics=("parallel",)),
    )(x_blocks, params["qkv_w"], jnp.asarray(poolh), jnp.asarray(mask), pb, fb,
      jnp.asarray(gsum), jnp.asarray(shift), w9, dwc_b, params["proj_w"], proj_b)

    return out.reshape(b, n, c)


# ----------------------------------------------------------------------------
# Main
# ----------------------------------------------------------------------------

if __name__ == "__main__":
    # Small shapes consistent with the module:
    #   dim=32, num_heads=4 (head_dim=8), fused_num=4 (pool 2x2), window=4,
    #   batch=2, n=64 (8x8 spatial).
    DIM, NUM_HEADS, FUSED_NUM, WINDOW = 32, 4, 4, 4
    B, N = 2, 64

    key = jax.random.PRNGKey(0)
    kx, kp = jax.random.split(key)
    x = jax.random.normal(kx, (B, N, DIM), jnp.float32)
    params = make_params(kp, DIM, NUM_HEADS, FUSED_NUM, WINDOW)

    fwd = jax.jit(functools.partial(
        fused_attention_forward,
        num_heads=NUM_HEADS, fused_num=FUSED_NUM, window=WINDOW))

    out = fwd(x, params)
    jax.block_until_ready(out)
    assert out.shape == (B, N, DIM)
    assert bool(jnp.all(jnp.isfinite(out)))
    print("KERNEL_OK")
</pallas_src>

<mosaic_0001>
module attributes {stable_mosaic.version = 11 : i64} {
  func.func @_fused_attention_kernel(%arg0: i32, %arg1: memref<1x128x32xf32, #tpu.memory_space<vmem>>, %arg2: memref<32x96xf32, #tpu.memory_space<vmem>>, %arg3: memref<16x64xf32, #tpu.memory_space<vmem>>, %arg4: memref<16x32xf32, #tpu.memory_space<vmem>>, %arg5: memref<16x64xf32, #tpu.memory_space<vmem>>, %arg6: memref<64x16xf32, #tpu.memory_space<vmem>>, %arg7: memref<16x16xf32, #tpu.memory_space<vmem>>, %arg8: memref<576x64xf32, #tpu.memory_space<vmem>>, %arg9: memref<9x32xf32, #tpu.memory_space<vmem>>, %arg10: memref<1x32xf32, #tpu.memory_space<vmem>>, %arg11: memref<32x32xf32, #tpu.memory_space<vmem>>, %arg12: memref<1x32xf32, #tpu.memory_space<vmem>>, %arg13: memref<1x128x32xf32, #tpu.memory_space<vmem>>) attributes {dimension_semantics = [#tpu.dimension_semantics<parallel>], iteration_bounds = array<i64: 1>, scalar_prefetch = 0 : i64, scratch_operands = 0 : i64, tpu.core_type = #tpu.core_type<tc>, window_params = [{transform_indices = @transform_0, window_bounds = array<i64: 1, 128, 32>}, {pipeline_mode = #tpu.pipeline_mode<synchronous>, transform_indices = @transform_1, window_bounds = array<i64: 32, 96>}, {pipeline_mode = #tpu.pipeline_mode<synchronous>, transform_indices = @transform_2, window_bounds = array<i64: 16, 64>}, {pipeline_mode = #tpu.pipeline_mode<synchronous>, transform_indices = @transform_3, window_bounds = array<i64: 16, 32>}, {pipeline_mode = #tpu.pipeline_mode<synchronous>, transform_indices = @transform_4, window_bounds = array<i64: 16, 64>}, {pipeline_mode = #tpu.pipeline_mode<synchronous>, transform_indices = @transform_5, window_bounds = array<i64: 64, 16>}, {pipeline_mode = #tpu.pipeline_mode<synchronous>, transform_indices = @transform_6, window_bounds = array<i64: 16, 16>}, {pipeline_mode = #tpu.pipeline_mode<synchronous>, transform_indices = @transform_7, window_bounds = array<i64: 576, 64>}, {pipeline_mode = #tpu.pipeline_mode<synchronous>, transform_indices = @transform_8, window_bounds = array<i64: 9, 32>}, {pipeline_mode = #tpu.pipeline_mode<synchronous>, transform_indices = @transform_9, window_bounds = array<i64: 1, 32>}, {pipeline_mode = #tpu.pipeline_mode<synchronous>, transform_indices = @transform_10, window_bounds = array<i64: 32, 32>}, {pipeline_mode = #tpu.pipeline_mode<synchronous>, transform_indices = @transform_11, window_bounds = array<i64: 1, 32>}, {transform_indices = @transform_12, window_bounds = array<i64: 1, 128, 32>}]} {
    %c0 = arith.constant 0 : index
    %c0_0 = arith.constant 0 : index
    %c0_1 = arith.constant 0 : index
    %0 = vector.load %arg1[%c0, %c0_0, %c0_1] : memref<1x128x32xf32, #tpu.memory_space<vmem>>, vector<1x128x32xf32>
    %1 = vector.shape_cast %0 : vector<1x128x32xf32> to vector<128x32xf32>
    %c0_2 = arith.constant 0 : index
    %c0_3 = arith.constant 0 : index
    %2 = vector.load %arg2[%c0_2, %c0_3] : memref<32x96xf32, #tpu.memory_space<vmem>>, vector<32x96xf32>
    %cst = arith.constant dense<0.000000e+00> : vector<128x96xf32>
    %3 = tpu.matmul %1, %2, %cst {dimension_numbers = #tpu.dot_dimension_numbers<[1], [0], [0], [1], [0, 0, 1, 1], [], []>} : vector<128x32xf32>, vector<32x96xf32>, vector<128x96xf32> -> vector<128x96xf32>
    %4 = vector.extract_strided_slice %3 {offsets = [0, 0], sizes = [128, 32], strides = [1, 1]} : vector<128x96xf32> to vector<128x32xf32>
    %5 = vector.extract_strided_slice %3 {offsets = [0, 32], sizes = [128, 32], strides = [1, 1]} : vector<128x96xf32> to vector<128x32xf32>
    %6 = vector.extract_strided_slice %3 {offsets = [0, 64], sizes = [128, 32], strides = [1, 1]} : vector<128x96xf32> to vector<128x32xf32>
    %c0_4 = arith.constant 0 : index
    %c0_5 = arith.constant 0 : index
    %7 = vector.load %arg3[%c0_4, %c0_5] : memref<16x64xf32, #tpu.memory_space<vmem>>, vector<16x64xf32>
    %c0_6 = arith.constant 0 : index
    %c0_7 = arith.constant 0 : index
    %8 = vector.load %arg4[%c0_6, %c0_7] : memref<16x32xf32, #tpu.memory_space<vmem>>, vector<16x32xf32>
    %c0_8 = arith.constant 0 : index
    %c0_9 = arith.constant 0 : index
    %9 = vector.load %arg5[%c0_8, %c0_9] : memref<16x64xf32, #tpu.memory_space<vmem>>, vector<16x64xf32>
    %c0_10 = arith.constant 0 : index
    %c0_11 = arith.constant 0 : index
    %10 = vector.load %arg6[%c0_10, %c0_11] : memref<64x16xf32, #tpu.memory_space<vmem>>, vector<64x16xf32>
    %c0_12 = arith.constant 0 : index
    %c0_13 = arith.constant 0 : index
    %11 = vector.load %arg7[%c0_12, %c0_13] : memref<16x16xf32, #tpu.memory_space<vmem>>, vector<16x16xf32>
    %c0_14 = arith.constant 0 : index
    %c0_15 = arith.constant 0 : index
    %12 = vector.load %arg8[%c0_14, %c0_15] : memref<576x64xf32, #tpu.memory_space<vmem>>, vector<576x64xf32>
    %c0_16 = arith.constant 0 : index
    %c0_17 = arith.constant 0 : index
    %13 = vector.load %arg9[%c0_16, %c0_17] : memref<9x32xf32, #tpu.memory_space<vmem>>, vector<9x32xf32>
    %14 = vector.extract_strided_slice %4 {offsets = [0, 0], sizes = [64, 32], strides = [1, 1]} : vector<128x32xf32> to vector<64x32xf32>
    %15 = vector.extract_strided_slice %5 {offsets = [0, 0], sizes = [64, 32], strides = [1, 1]} : vector<128x32xf32> to vector<64x32xf32>
    %16 = vector.extract_strided_slice %6 {offsets = [0, 0], sizes = [64, 32], strides = [1, 1]} : vector<128x32xf32> to vector<64x32xf32>
    %cst_18 = arith.constant dense<0.000000e+00> : vector<16x32xf32>
    %17 = tpu.matmul %7, %14, %cst_18 {dimension_numbers = #tpu.dot_dimension_numbers<[1], [0], [0], [1], [0, 0, 1, 1], [], []>} : vector<16x64xf32>, vector<64x32xf32>, vector<16x32xf32> -> vector<16x32xf32>
    %18 = arith.mulf %17, %8 : vector<16x32xf32>
    %cst_19 = arith.constant dense<0.000000e+00> : vector<16x64xf32>
    %19 = tpu.matmul %18, %15, %cst_19 {dimension_numbers = #tpu.dot_dimension_numbers<[1], [1], [0], [0], [0, 0, 1, 0], [], []>} : vector<16x32xf32>, vector<64x32xf32>, vector<16x64xf32> -> vector<16x64xf32>
    %20 = arith.addf %19, %9 : vector<16x64xf32>
    %cst_20 = arith.constant dense<0xFF800000> : vector<16xf32>
    %21 = vector.multi_reduction <maximumf>, %20, %cst_20 [1] : vector<16x64xf32> to vector<16xf32>
    %22 = vector.shape_cast %21 : vector<16xf32> to vector<16x1xf32>
    %23 = vector.broadcast %22 : vector<16x1xf32> to vector<16x64xf32>
    %24 = arith.subf %20, %23 : vector<16x64xf32>
    %25 = math.exp %24 : vector<16x64xf32>
    %cst_21 = arith.constant dense<0.000000e+00> : vector<16xf32>
    %26 = vector.multi_reduction <add>, %25, %cst_21 [1] : vector<16x64xf32> to vector<16xf32>
    %27 = vector.shape_cast %26 : vector<16xf32> to vector<16x1xf32>
    %28 = vector.broadcast %27 : vector<16x1xf32> to vector<16x64xf32>
    %29 = arith.divf %25, %28 : vector<16x64xf32>
    %cst_22 = arith.constant dense<0.000000e+00> : vector<16x32xf32>
    %30 = tpu.matmul %29, %16, %cst_22 {dimension_numbers = #tpu.dot_dimension_numbers<[1], [0], [0], [1], [0, 0, 1, 1], [], []>} : vector<16x64xf32>, vector<64x32xf32>, vector<16x32xf32> -> vector<16x32xf32>
    %31 = arith.mulf %30, %8 : vector<16x32xf32>
    %cst_23 = arith.constant dense<0.000000e+00> : vector<64x16xf32>
    %32 = tpu.matmul %14, %18, %cst_23 {dimension_numbers = #tpu.dot_dimension_numbers<[1], [1], [0], [0], [0, 0, 1, 0], [], []>} : vector<64x32xf32>, vector<16x32xf32>, vector<64x16xf32> -> vector<64x16xf32>
    %33 = arith.addf %32, %10 : vector<64x16xf32>
    %cst_24 = arith.constant dense<0xFF800000> : vector<64xf32>
    %34 = vector.multi_reduction <maximumf>, %33, %cst_24 [1] : vector<64x16xf32> to vector<64xf32>
    %35 = vector.shape_cast %34 : vector<64xf32> to vector<64x1xf32>
    %36 = vector.broadcast %35 : vector<64x1xf32> to vector<64x16xf32>
    %37 = arith.subf %33, %36 : vector<64x16xf32>
    %38 = math.exp %37 : vector<64x16xf32>
    %cst_25 = arith.constant dense<0.000000e+00> : vector<64x16xf32>
    %39 = tpu.matmul %38, %11, %cst_25 {dimension_numbers = #tpu.dot_dimension_numbers<[1], [0], [0], [1], [0, 0, 1, 1], [], []>} : vector<64x16xf32>, vector<16x16xf32>, vector<64x16xf32> -> vector<64x16xf32>
    %40 = arith.divf %38, %39 : vector<64x16xf32>
    %cst_26 = arith.constant dense<0.000000e+00> : vector<64x32xf32>
    %41 = tpu.matmul %40, %31, %cst_26 {dimension_numbers = #tpu.dot_dimension_numbers<[1], [0], [0], [1], [0, 0, 1, 1], [], []>} : vector<64x16xf32>, vector<16x32xf32>, vector<64x32xf32> -> vector<64x32xf32>
    %cst_27 = arith.constant dense<0.000000e+00> : vector<576x32xf32>
    %42 = tpu.matmul %12, %16, %cst_27 {dimension_numbers = #tpu.dot_dimension_numbers<[1], [0], [0], [1], [0, 0, 1, 1], [], []>} : vector<576x64xf32>, vector<64x32xf32>, vector<576x32xf32> -> vector<576x32xf32>
    %43 = vector.extract_strided_slice %42 {offsets = [0, 0], sizes = [64, 32], strides = [1, 1]} : vector<576x32xf32> to vector<64x32xf32>
    %44 = vector.extract_strided_slice %13 {offsets = [0, 0], sizes = [1, 32], strides = [1, 1]} : vector<9x32xf32> to vector<1x32xf32>
    %45 = vector.broadcast %44 : vector<1x32xf32> to vector<64x32xf32>
    %46 = arith.mulf %43, %45 : vector<64x32xf32>
    %47 = vector.extract_strided_slice %42 {offsets = [64, 0], sizes = [64, 32], strides = [1, 1]} : vector<576x32xf32> to vector<64x32xf32>
    %48 = vector.extract_strided_slice %13 {offsets = [1, 0], sizes = [1, 32], strides = [1, 1]} : vector<9x32xf32> to vector<1x32xf32>
    %49 = vector.broadcast %48 : vector<1x32xf32> to vector<64x32xf32>
    %50 = arith.mulf %47, %49 : vector<64x32xf32>
    %51 = arith.addf %46, %50 : vector<64x32xf32>
    %52 = vector.extract_strided_slice %42 {offsets = [128, 0], sizes = [64, 32], strides = [1, 1]} : vector<576x32xf32> to vector<64x32xf32>
    %53 = vector.extract_strided_slice %13 {offsets = [2, 0], sizes = [1, 32], strides = [1, 1]} : vector<9x32xf32> to vector<1x32xf32>
    %54 = vector.broadcast %53 : vector<1x32xf32> to vector<64x32xf32>
    %55 = arith.mulf %52, %54 : vector<64x32xf32>
    %56 = arith.addf %51, %55 : vector<64x32xf32>
    %57 = vector.extract_strided_slice %42 {offsets = [192, 0], sizes = [64, 32], strides = [1, 1]} : vector<576x32xf32> to vector<64x32xf32>
    %58 = vector.extract_strided_slice %13 {offsets = [3, 0], sizes = [1, 32], strides = [1, 1]} : vector<9x32xf32> to vector<1x32xf32>
    %59 = vector.broadcast %58 : vector<1x32xf32> to vector<64x32xf32>
    %60 = arith.mulf %57, %59 : vector<64x32xf32>
    %61 = arith.addf %56, %60 : vector<64x32xf32>
    %62 = vector.extract_strided_slice %42 {offsets = [256, 0], sizes = [64, 32], strides = [1, 1]} : vector<576x32xf32> to vector<64x32xf32>
    %63 = vector.extract_strided_slice %13 {offsets = [4, 0], sizes = [1, 32], strides = [1, 1]} : vector<9x32xf32> to vector<1x32xf32>
    %64 = vector.broadcast %63 : vector<1x32xf32> to vector<64x32xf32>
    %65 = arith.mulf %62, %64 : vector<64x32xf32>
    %66 = arith.addf %61, %65 : vector<64x32xf32>
    %67 = vector.extract_strided_slice %42 {offsets = [320, 0], sizes = [64, 32], strides = [1, 1]} : vector<576x32xf32> to vector<64x32xf32>
    %68 = vector.extract_strided_slice %13 {offsets = [5, 0], sizes = [1, 32], strides = [1, 1]} : vector<9x32xf32> to vector<1x32xf32>
    %69 = vector.broadcast %68 : vector<1x32xf32> to vector<64x32xf32>
    %70 = arith.mulf %67, %69 : vector<64x32xf32>
    %71 = arith.addf %66, %70 : vector<64x32xf32>
    %72 = vector.extract_strided_slice %42 {offsets = [384, 0], sizes = [64, 32], strides = [1, 1]} : vector<576x32xf32> to vector<64x32xf32>
    %73 = vector.extract_strided_slice %13 {offsets = [6, 0], sizes = [1, 32], strides = [1, 1]} : vector<9x32xf32> to vector<1x32xf32>
    %74 = vector.broadcast %73 : vector<1x32xf32> to vector<64x32xf32>
    %75 = arith.mulf %72, %74 : vector<64x32xf32>
    %76 = arith.addf %71, %75 : vector<64x32xf32>
    %77 = vector.extract_strided_slice %42 {offsets = [448, 0], sizes = [64, 32], strides = [1, 1]} : vector<576x32xf32> to vector<64x32xf32>
    %78 = vector.extract_strided_slice %13 {offsets = [7, 0], sizes = [1, 32], strides = [1, 1]} : vector<9x32xf32> to vector<1x32xf32>
    %79 = vector.broadcast %78 : vector<1x32xf32> to vector<64x32xf32>
    %80 = arith.mulf %77, %79 : vector<64x32xf32>
    %81 = arith.addf %76, %80 : vector<64x32xf32>
    %82 = vector.extract_strided_slice %42 {offsets = [512, 0], sizes = [64, 32], strides = [1, 1]} : vector<576x32xf32> to vector<64x32xf32>
    %83 = vector.extract_strided_slice %13 {offsets = [8, 0], sizes = [1, 32], strides = [1, 1]} : vector<9x32xf32> to vector<1x32xf32>
    %84 = vector.broadcast %83 : vector<1x32xf32> to vector<64x32xf32>
    %85 = arith.mulf %82, %84 : vector<64x32xf32>
    %86 = arith.addf %81, %85 : vector<64x32xf32>
    %87 = arith.addf %41, %86 : vector<64x32xf32>
    %88 = vector.extract_strided_slice %4 {offsets = [64, 0], sizes = [64, 32], strides = [1, 1]} : vector<128x32xf32> to vector<64x32xf32>
    %89 = vector.extract_strided_slice %5 {offsets = [64, 0], sizes = [64, 32], strides = [1, 1]} : vector<128x32xf32> to vector<64x32xf32>
    %90 = vector.extract_strided_slice %6 {offsets = [64, 0], sizes = [64, 32], strides = [1, 1]} : vector<128x32xf32> to vector<64x32xf32>
    %cst_28 = arith.constant dense<0.000000e+00> : vector<16x32xf32>
    %91 = tpu.matmul %7, %88, %cst_28 {dimension_numbers = #tpu.dot_dimension_numbers<[1], [0], [0], [1], [0, 0, 1, 1], [], []>} : vector<16x64xf32>, vector<64x32xf32>, vector<16x32xf32> -> vector<16x32xf32>
    %92 = arith.mulf %91, %8 : vector<16x32xf32>
    %cst_29 = arith.constant dense<0.000000e+00> : vector<16x64xf32>
    %93 = tpu.matmul %92, %89, %cst_29 {dimension_numbers = #tpu.dot_dimension_numbers<[1], [1], [0], [0], [0, 0, 1, 0], [], []>} : vector<16x32xf32>, vector<64x32xf32>, vector<16x64xf32> -> vector<16x64xf32>
    %94 = arith.addf %93, %9 : vector<16x64xf32>
    %cst_30 = arith.constant dense<0xFF800000> : vector<16xf32>
    %95 = vector.multi_reduction <maximumf>, %94, %cst_30 [1] : vector<16x64xf32> to vector<16xf32>
    %96 = vector.shape_cast %95 : vector<16xf32> to vector<16x1xf32>
    %97 = vector.broadcast %96 : vector<16x1xf32> to vector<16x64xf32>
    %98 = arith.subf %94, %97 : vector<16x64xf32>
    %99 = math.exp %98 : vector<16x64xf32>
    %cst_31 = arith.constant dense<0.000000e+00> : vector<16xf32>
    %100 = vector.multi_reduction <add>, %99, %cst_31 [1] : vector<16x64xf32> to vector<16xf32>
    %101 = vector.shape_cast %100 : vector<16xf32> to vector<16x1xf32>
    %102 = vector.broadcast %101 : vector<16x1xf32> to vector<16x64xf32>
    %103 = arith.divf %99, %102 : vector<16x64xf32>
    %cst_32 = arith.constant dense<0.000000e+00> : vector<16x32xf32>
    %104 = tpu.matmul %103, %90, %cst_32 {dimension_numbers = #tpu.dot_dimension_numbers<[1], [0], [0], [1], [0, 0, 1, 1], [], []>} : vector<16x64xf32>, vector<64x32xf32>, vector<16x32xf32> -> vector<16x32xf32>
    %105 = arith.mulf %104, %8 : vector<16x32xf32>
    %cst_33 = arith.constant dense<0.000000e+00> : vector<64x16xf32>
    %106 = tpu.matmul %88, %92, %cst_33 {dimension_numbers = #tpu.dot_dimension_numbers<[1], [1], [0], [0], [0, 0, 1, 0], [], []>} : vector<64x32xf32>, vector<16x32xf32>, vector<64x16xf32> -> vector<64x16xf32>
    %107 = arith.addf %106, %10 : vector<64x16xf32>
    %cst_34 = arith.constant dense<0xFF800000> : vector<64xf32>
    %108 = vector.multi_reduction <maximumf>, %107, %cst_34 [1] : vector<64x16xf32> to vector<64xf32>
    %109 = vector.shape_cast %108 : vector<64xf32> to vector<64x1xf32>
    %110 = vector.broadcast %109 : vector<64x1xf32> to vector<64x16xf32>
    %111 = arith.subf %107, %110 : vector<64x16xf32>
    %112 = math.exp %111 : vector<64x16xf32>
    %cst_35 = arith.constant dense<0.000000e+00> : vector<64x16xf32>
    %113 = tpu.matmul %112, %11, %cst_35 {dimension_numbers = #tpu.dot_dimension_numbers<[1], [0], [0], [1], [0, 0, 1, 1], [], []>} : vector<64x16xf32>, vector<16x16xf32>, vector<64x16xf32> -> vector<64x16xf32>
    %114 = arith.divf %112, %113 : vector<64x16xf32>
    %cst_36 = arith.constant dense<0.000000e+00> : vector<64x32xf32>
    %115 = tpu.matmul %114, %105, %cst_36 {dimension_numbers = #tpu.dot_dimension_numbers<[1], [0], [0], [1], [0, 0, 1, 1], [], []>} : vector<64x16xf32>, vector<16x32xf32>, vector<64x32xf32> -> vector<64x32xf32>
    %cst_37 = arith.constant dense<0.000000e+00> : vector<576x32xf32>
    %116 = tpu.matmul %12, %90, %cst_37 {dimension_numbers = #tpu.dot_dimension_numbers<[1], [0], [0], [1], [0, 0, 1, 1], [], []>} : vector<576x64xf32>, vector<64x32xf32>, vector<576x32xf32> -> vector<576x32xf32>
    %117 = vector.extract_strided_slice %116 {offsets = [0, 0], sizes = [64, 32], strides = [1, 1]} : vector<576x32xf32> to vector<64x32xf32>
    %118 = vector.extract_strided_slice %13 {offsets = [0, 0], sizes = [1, 32], strides = [1, 1]} : vector<9x32xf32> to vector<1x32xf32>
    %119 = vector.broadcast %118 : vector<1x32xf32> to vector<64x32xf32>
    %120 = arith.mulf %117, %119 : vector<64x32xf32>
    %121 = vector.extract_strided_slice %116 {offsets = [64, 0], sizes = [64, 32], strides = [1, 1]} : vector<576x32xf32> to vector<64x32xf32>
    %122 = vector.extract_strided_slice %13 {offsets = [1, 0], sizes = [1, 32], strides = [1, 1]} : vector<9x32xf32> to vector<1x32xf32>
    %123 = vector.broadcast %122 : vector<1x32xf32> to vector<64x32xf32>
    %124 = arith.mulf %121, %123 : vector<64x32xf32>
    %125 = arith.addf %120, %124 : vector<64x32xf32>
    %126 = vector.extract_strided_slice %116 {offsets = [128, 0], sizes = [64, 32], strides = [1, 1]} : vector<576x32xf32> to vector<64x32xf32>
    %127 = vector.extract_strided_slice %13 {offsets = [2, 0], sizes = [1, 32], strides = [1, 1]} : vector<9x32xf32> to vector<1x32xf32>
    %128 = vector.broadcast %127 : vector<1x32xf32> to vector<64x32xf32>
    %129 = arith.mulf %126, %128 : vector<64x32xf32>
    %130 = arith.addf %125, %129 : vector<64x32xf32>
    %131 = vector.extract_strided_slice %116 {offsets = [192, 0], sizes = [64, 32], strides = [1, 1]} : vector<576x32xf32> to vector<64x32xf32>
    %132 = vector.extract_strided_slice %13 {offsets = [3, 0], sizes = [1, 32], strides = [1, 1]} : vector<9x32xf32> to vector<1x32xf32>
    %133 = vector.broadcast %132 : vector<1x32xf32> to vector<64x32xf32>
    %134 = arith.mulf %131, %133 : vector<64x32xf32>
    %135 = arith.addf %130, %134 : vector<64x32xf32>
    %136 = vector.extract_strided_slice %116 {offsets = [256, 0], sizes = [64, 32], strides = [1, 1]} : vector<576x32xf32> to vector<64x32xf32>
    %137 = vector.extract_strided_slice %13 {offsets = [4, 0], sizes = [1, 32], strides = [1, 1]} : vector<9x32xf32> to vector<1x32xf32>
    %138 = vector.broadcast %137 : vector<1x32xf32> to vector<64x32xf32>
    %139 = arith.mulf %136, %138 : vector<64x32xf32>
    %140 = arith.addf %135, %139 : vector<64x32xf32>
    %141 = vector.extract_strided_slice %116 {offsets = [320, 0], sizes = [64, 32], strides = [1, 1]} : vector<576x32xf32> to vector<64x32xf32>
    %142 = vector.extract_strided_slice %13 {offsets = [5, 0], sizes = [1, 32], strides = [1, 1]} : vector<9x32xf32> to vector<1x32xf32>
    %143 = vector.broadcast %142 : vector<1x32xf32> to vector<64x32xf32>
    %144 = arith.mulf %141, %143 : vector<64x32xf32>
    %145 = arith.addf %140, %144 : vector<64x32xf32>
    %146 = vector.extract_strided_slice %116 {offsets = [384, 0], sizes = [64, 32], strides = [1, 1]} : vector<576x32xf32> to vector<64x32xf32>
    %147 = vector.extract_strided_slice %13 {offsets = [6, 0], sizes = [1, 32], strides = [1, 1]} : vector<9x32xf32> to vector<1x32xf32>
    %148 = vector.broadcast %147 : vector<1x32xf32> to vector<64x32xf32>
    %149 = arith.mulf %146, %148 : vector<64x32xf32>
    %150 = arith.addf %145, %149 : vector<64x32xf32>
    %151 = vector.extract_strided_slice %116 {offsets = [448, 0], sizes = [64, 32], strides = [1, 1]} : vector<576x32xf32> to vector<64x32xf32>
    %152 = vector.extract_strided_slice %13 {offsets = [7, 0], sizes = [1, 32], strides = [1, 1]} : vector<9x32xf32> to vector<1x32xf32>
    %153 = vector.broadcast %152 : vector<1x32xf32> to vector<64x32xf32>
    %154 = arith.mulf %151, %153 : vector<64x32xf32>
    %155 = arith.addf %150, %154 : vector<64x32xf32>
    %156 = vector.extract_strided_slice %116 {offsets = [512, 0], sizes = [64, 32], strides = [1, 1]} : vector<576x32xf32> to vector<64x32xf32>
    %157 = vector.extract_strided_slice %13 {offsets = [8, 0], sizes = [1, 32], strides = [1, 1]} : vector<9x32xf32> to vector<1x32xf32>
    %158 = vector.broadcast %157 : vector<1x32xf32> to vector<64x32xf32>
    %159 = arith.mulf %156, %158 : vector<64x32xf32>
    %160 = arith.addf %155, %159 : vector<64x32xf32>
    %161 = arith.addf %115, %160 : vector<64x32xf32>
    %162 = tpu.concatenate %87, %161 in 0 : vector<64x32xf32>, vector<64x32xf32> -> vector<128x32xf32>
    %c0_38 = arith.constant 0 : index
    %c0_39 = arith.constant 0 : index
    %163 = vector.load %arg10[%c0_38, %c0_39] : memref<1x32xf32, #tpu.memory_space<vmem>>, vector<1x32xf32>
    %164 = vector.broadcast %163 : vector<1x32xf32> to vector<128x32xf32>
    %165 = arith.addf %162, %164 : vector<128x32xf32>
    %c0_40 = arith.constant 0 : index
    %c0_41 = arith.constant 0 : index
    %166 = vector.load %arg11[%c0_40, %c0_41] : memref<32x32xf32, #tpu.memory_space<vmem>>, vector<32x32xf32>
    %cst_42 = arith.constant dense<0.000000e+00> : vector<128x32xf32>
    %167 = tpu.matmul %165, %166, %cst_42 {dimension_numbers = #tpu.dot_dimension_numbers<[1], [0], [0], [1], [0, 0, 1, 1], [], []>} : vector<128x32xf32>, vector<32x32xf32>, vector<128x32xf32> -> vector<128x32xf32>
    %c0_43 = arith.constant 0 : index
    %c0_44 = arith.constant 0 : index
    %168 = vector.load %arg12[%c0_43, %c0_44] : memref<1x32xf32, #tpu.memory_space<vmem>>, vector<1x32xf32>
    %169 = vector.broadcast %168 : vector<1x32xf32> to vector<128x32xf32>
    %170 = arith.addf %167, %169 : vector<128x32xf32>
    %c0_45 = arith.constant 0 : index
    %c0_46 = arith.constant 0 : index
    %c0_47 = arith.constant 0 : index
    %171 = vector.load %arg13[%c0_45, %c0_46, %c0_47] : memref<1x128x32xf32, #tpu.memory_space<vmem>>, vector<1x128x32xf32>
    %172 = vector.shape_cast %171 : vector<1x128x32xf32> to vector<128x32xf32>
    %173 = vector.shape_cast %170 : vector<128x32xf32> to vector<1x128x32xf32>
    tpu.vector_store %arg13[%c0_45, %c0_46, %c0_47], %173 {strides = array<i32>} : memref<1x128x32xf32, #tpu.memory_space<vmem>>, vector<1x128x32xf32>,
    return
  }
  func.func @transform_0(%arg0: i32) -> (i32, i32, i32) {
    %c0_i32 = arith.constant 0 : i32
    %c0_i32_0 = arith.constant 0 : i32
    %c0_i32_1 = arith.constant 0 : i32
    return %arg0, %c0_i32, %c0_i32_0 : i32, i32, i32
  }
  func.func @transform_1(%arg0: i32) -> (i32, i32) {
    %c0_i32 = arith.constant 0 : i32
    %c0_i32_0 = arith.constant 0 : i32
    %c0_i32_1 = arith.constant 0 : i32
    return %c0_i32, %c0_i32_0 : i32, i32
  }
  func.func @transform_2(%arg0: i32) -> (i32, i32) {
    %c0_i32 = arith.constant 0 : i32
    %c0_i32_0 = arith.constant 0 : i32
    %c0_i32_1 = arith.constant 0 : i32
    return %c0_i32, %c0_i32_0 : i32, i32
  }
  func.func @transform_3(%arg0: i32) -> (i32, i32) {
    %c0_i32 = arith.constant 0 : i32
    %c0_i32_0 = arith.constant 0 : i32
    %c0_i32_1 = arith.constant 0 : i32
    return %c0_i32, %c0_i32_0 : i32, i32
  }
  func.func @transform_4(%arg0: i32) -> (i32, i32) {
    %c0_i32 = arith.constant 0 : i32
    %c0_i32_0 = arith.constant 0 : i32
    %c0_i32_1 = arith.constant 0 : i32
    return %c0_i32, %c0_i32_0 : i32, i32
  }
  func.func @transform_5(%arg0: i32) -> (i32, i32) {
    %c0_i32 = arith.constant 0 : i32
    %c0_i32_0 = arith.constant 0 : i32
    %c0_i32_1 = arith.constant 0 : i32
    return %c0_i32, %c0_i32_0 : i32, i32
  }
  func.func @transform_6(%arg0: i32) -> (i32, i32) {
    %c0_i32 = arith.constant 0 : i32
    %c0_i32_0 = arith.constant 0 : i32
    %c0_i32_1 = arith.constant 0 : i32
    return %c0_i32, %c0_i32_0 : i32, i32
  }
  func.func @transform_7(%arg0: i32) -> (i32, i32) {
    %c0_i32 = arith.constant 0 : i32
    %c0_i32_0 = arith.constant 0 : i32
    %c0_i32_1 = arith.constant 0 : i32
    return %c0_i32, %c0_i32_0 : i32, i32
  }
  func.func @transform_8(%arg0: i32) -> (i32, i32) {
    %c0_i32 = arith.constant 0 : i32
    %c0_i32_0 = arith.constant 0 : i32
    %c0_i32_1 = arith.constant 0 : i32
    return %c0_i32, %c0_i32_0 : i32, i32
  }
  func.func @transform_9(%arg0: i32) -> (i32, i32) {
    %c0_i32 = arith.constant 0 : i32
    %c0_i32_0 = arith.constant 0 : i32
    %c0_i32_1 = arith.constant 0 : i32
    return %c0_i32, %c0_i32_0 : i32, i32
  }
  func.func @transform_10(%arg0: i32) -> (i32, i32) {
    %c0_i32 = arith.constant 0 : i32
    %c0_i32_0 = arith.constant 0 : i32
    %c0_i32_1 = arith.constant 0 : i32
    return %c0_i32, %c0_i32_0 : i32, i32
  }
  func.func @transform_11(%arg0: i32) -> (i32, i32) {
    %c0_i32 = arith.constant 0 : i32
    %c0_i32_0 = arith.constant 0 : i32
    %c0_i32_1 = arith.constant 0 : i32
    return %c0_i32, %c0_i32_0 : i32, i32
  }
  func.func @transform_12(%arg0: i32) -> (i32, i32, i32) {
    %c0_i32 = arith.constant 0 : i32
    %c0_i32_0 = arith.constant 0 : i32
    %c0_i32_1 = arith.constant 0 : i32
    return %arg0, %c0_i32, %c0_i32_0 : i32, i32, i32
  }
}

</mosaic_0001>

<bundles_post_ra>
// kernel: fused_attention_forward.1
= control target key start
LH: loop header
LB: loop body
LE: loop exit
PB: predicated region body
PF: predicated region fallthrough
CT: control target
= control target key end

     0   :  { %vm61_vm0 = vcmask 261120   ;;  %vm345_vm1 = vcmask 523264   ;;  %s5053_s28 = smov 96   ;;  %s5054_s17 = smov 64   ;;  %vm800_vm3 = vcmask 130048   ;;  %s6602_s1 = inlined_call_operand.vmem [shape: f32[32,96], index: 1, kind: input, shape index: {}]   ;;  %s6603_s0 = inlined_call_operand.vmem [shape: f32[1,128,32], index: 0, kind: input, shape index: {}]   ;;  %s6604_s2 = inlined_call_operand.vmem [shape: f32[16,64], index: 2, kind: input, shape index: {}]   ;;  %s6605_s3 = inlined_call_operand.vmem [shape: f32[16,32], index: 3, kind: input, shape index: {}]   ;;  %s6606_s4 = inlined_call_operand.vmem [shape: f32[16,64], index: 4, kind: input, shape index: {}]   ;;  %s6607_s6 = inlined_call_operand.vmem [shape: f32[16,16], index: 6, kind: input, shape index: {}]   ;;  %s6608_s5 = inlined_call_operand.vmem [shape: f32[64,16], index: 5, kind: input, shape index: {}]   ;;  %s6609_s7 = inlined_call_operand.vmem [shape: f32[576,64], index: 7, kind: input, shape index: {}]   ;;  %s6610_s8 = inlined_call_operand.vmem [shape: f32[9,32], index: 8, kind: input, shape index: {}]   ;;  %s6611_s10 = inlined_call_operand.vmem [shape: f32[32,32], index: 10, kind: input, shape index: {}]   ;;  %s6612_s9 = inlined_call_operand.vmem [shape: f32[1,32], index: 9, kind: input, shape index: {}]   ;;  %s6613_s11 = inlined_call_operand.vmem [shape: f32[1,32], index: 11, kind: input, shape index: {}]   ;;  %s6614_s12 = inlined_call_operand.vmem [shape: f32[1,128,32], index: 12, kind: output, shape index: {}]  }
   0x1   :  { %v57_v0 = vld [vmem:[%s6602_s1] sm:$0xff]  ;;  %v58_v1 = vld [vmem:[%s6602_s1 + $0x8] sm:$0xff]  ;;  %v59_v2 = vld [vmem:[%s6602_s1 + $0x10] sm:$0xff] }
   0x2   :  { %v4615_v3 = vpack.c.bf16 %v58_v1, %v57_v0  ;;  %v60_v4 = vld [vmem:[%s6602_s1 + $0x18] sm:$0xff]  ;;  %v41_v5 = vld [vmem:[%s6603_s0] sm:$0xff]  ;;  %v42_v7 = vld [vmem:[%s6603_s0 + $0x8] sm:$0xff] }
   0x3   :  { %v4619_v6 = vpack.c.bf16 %v60_v4, %v59_v2  ;;  %4101 = vmatprep.mubr.msk.f32.mxu0 %vm61_vm0, %v41_v5  ;;  %v43_v8 = vld [vmem:[%s6603_s0 + $0x10] sm:$0xff]  ;;  %v44_v9 = vld [vmem:[%s6603_s0 + $0x18] sm:$0xff]  ;;  %v45_v10 = vld [vmem:[%s6603_s0 + $0x20] sm:$0xff] }
   0x4   :  { %4616 = vmatprep.subr.bf16.mxu0 %v4615_v3  ;;  %v46_v11 = vld [vmem:[%s6603_s0 + $0x28] sm:$0xff]  ;;  %v47_v12 = vld [vmem:[%s6603_s0 + $0x30] sm:$0xff]  ;;  %v48_v13 = vld [vmem:[%s6603_s0 + $0x38] sm:$0xff] }
   0x5   :  { %4618 = vmatpush3.bf16.msra.mxu0 %v4615_v3  ;;  %v255_v14 = vld [vmem:[%s6604_s2] sm:$0xff]  ;;  %v5219_v31 = vld [vmem:[%s6604_s2 + $0x8] sm:$0xff]  ;;  %v51_v34 = vld [vmem:[%s6603_s0 + $0x50] sm:$0xff] }
   0x6   :  { %4620 = vmatprep.subr.bf16.mxu0 %v4619_v6  ;;  %4141 = vmatprep.mubr.msk.f32.mxu1 %vm345_vm1, %v255_v14  ;;  %v49_v32 = vld [vmem:[%s6603_s0 + $0x40] sm:$0xff]  ;;  %v50_v33 = vld [vmem:[%s6603_s0 + $0x48] sm:$0xff]  ;;  %v52_v35 = vld [vmem:[%s6603_s0 + $0x58] sm:$0xff] }
   0x7   :  { %v53_v36 = vld [vmem:[%s6603_s0 + $0x60] sm:$0xff]  ;;  %v54_v37 = vld [vmem:[%s6603_s0 + $0x68] sm:$0xff]  ;;  %v55_v38 = vld [vmem:[%s6603_s0 + $0x70] sm:$0xff] }
   0x8   :  { %v56_v39 = vld [vmem:[%s6603_s0 + $0x78] sm:$0xff]  ;;  %vm5257_vm2 = vmpackc.low %vm61_vm0, %vm61_vm0  ;;  %v5280_v57 = vld [vmem:[%s6605_s3 + $0x8] sm:$0xff] }
   0x9   :  { %4622 = vmatpush3.bf16.msra.mxu0 %v4619_v6  ;;  %v5285_v58 = vld [vmem:[%s6605_s3] sm:$0xff] }
   0xc   :  { %4102 = vmatmul.mubr.msk.f32.vlgmr.msra.gmra.mrb[0].mxu0 %vm61_vm0, %v42_v7 }
   0xd   :  { %4104 = vmatprep.mubr.msk.f32.mxu0 %vm61_vm0, %v43_v8 }
  0x10   :  { %4105 = vmatmul.mubr.msk.f32.gmra.mrb[2].mxu0 %vm61_vm0, %v44_v9 }
  0x11   :  { %4107 = vmatprep.mubr.msk.f32.mxu0 %vm61_vm0, %v45_v10 }
  0x14   :  { %4108 = vmatmul.mubr.msk.f32.gmra.mrb[4].mxu0 %vm61_vm0, %v46_v11 }
  0x15   :  { %4110 = vmatprep.mubr.msk.f32.mxu0 %vm61_vm0, %v47_v12 }
  0x18   :  { %4111 = vmatmul.mubr.msk.f32.gmra.mrb[6].mxu0 %vm61_vm0, %v48_v13 }
  0x19   :  { %4113 = vmatprep.mubr.msk.f32.mxu0 %vm61_vm0, %v49_v32 }
  0x1c   :  { %4114 = vmatmul.mubr.msk.f32.gmra.mrb[8].mxu0 %vm61_vm0, %v50_v33 }
  0x1d   :  { %4116 = vmatprep.mubr.msk.f32.mxu0 %vm61_vm0, %v51_v34 }
  0x20   :  { %4117 = vmatmul.mubr.msk.f32.gmra.mrb[10].mxu0 %vm61_vm0, %v52_v35 }
  0x21   :  { %4119 = vmatprep.mubr.msk.f32.mxu0 %vm61_vm0, %v53_v36 }
  0x24   :  { %4120 = vmatmul.mubr.msk.f32.gmra.mrb[12].mxu0 %vm61_vm0, %v54_v37 }
  0x25   :  { %4122 = vmatprep.mubr.msk.f32.mxu0 %vm61_vm0, %v55_v38 }
  0x28   :  { %4123 = vmatmul.mubr.msk.f32.gmra.mrb[14].mxu0 %vm61_vm0, %v56_v39 }
  0xdf   :  { %v5168_v15 = vpop.f32.mrb[0].mxu0 }
  0xe0   :  { %v5170_v16 = vpop.f32.mrb[1].mxu0 }
  0xe1   :  { %v5174_v17 = vpack.i.bf16 %v5168_v15, %v5170_v16  ;;  %v4623_v18 = vpack.c.bf16 %v5168_v15, %v5170_v16 }
  0xe3   :  { %4808 = vrot.lane.b32.xlu0 %v5174_v17, %s5053_s28  ;;  %v5180_v19 = vpop.f32.mrb[2].mxu0  ;;  %4624 = vmatprep.subr.bf16.mxu1 %v4623_v18 }
  0xe4   :  { %v5182_v20 = vpop.f32.mrb[3].mxu0  ;;  %4626 = vmatpush3.bf16.msra.mxu1 %v4623_v18 }
  0xe5   :  { %v5186_v21 = vpack.i.bf16 %v5180_v19, %v5182_v20  ;;  %v4627_v22 = vpack.c.bf16 %v5180_v19, %v5182_v20 }
  0xe7   :  { %4813 = vrot.lane.b32.xlu0 %v5186_v21, %s5053_s28  ;;  %v5192_v23 = vpop.f32.mrb[4].mxu0  ;;  %4628 = vmatprep.subr.bf16.mxu1 %v4627_v22 }
  0xe8   :  { %v5194_v24 = vpop.f32.mrb[5].mxu0  ;;  %4630 = vmatpush3.bf16.msra.mxu1 %v4627_v22  ;;  %v260_v22 = vld [vmem:[%s6606_s4 + $0x8] sm:$0xff] }
  0xe9   :  { %v5198_v25 = vpack.i.bf16 %v5192_v23, %v5194_v24  ;;  %v4631_v26 = vpack.c.bf16 %v5192_v23, %v5194_v24 }
  0xeb   :  { %4818 = vrot.lane.b32.xlu1 %v5198_v25, %s5053_s28  ;;  %v5204_v27 = vpop.f32.mrb[6].mxu0  ;;  %4632 = vmatprep.subr.bf16.mxu1 %v4631_v26 }
  0xec   :  { %v5206_v28 = vpop.f32.mrb[7].mxu0  ;;  %4634 = vmatpush3.bf16.msra.mxu1 %v4631_v26  ;;  %v259_v26 = vld [vmem:[%s6606_s4] sm:$0xff] }
  0xed   :  { %v5210_v29 = vpack.i.bf16 %v5204_v27, %v5206_v28  ;;  %v4635_v30 = vpack.c.bf16 %v5204_v27, %v5206_v28 }
  0xef   :  { %4823 = vrot.lane.b32.xlu1 %v5210_v29, %s5053_s28  ;;  %4636 = vmatprep.subr.bf16.mxu1 %v4635_v30  ;;  %v5289_v63 = vpop.f32.mrb[8].mxu0 }
  0xf0   :  { %4638 = vmatpush3.bf16.msra.mxu1 %v4635_v30  ;;  %v5291_v0 = vpop.f32.mrb[9].mxu0 }
  0xf1   :  { %v5311_v8 = vpack.c.bf16 %v5289_v63, %v5291_v0  ;;  %v5315_v9 = vpack.i.bf16 %v5289_v63, %v5291_v0 }
  0xf3   :  { %4142 = vmatmul.mubr.msk.f32.vlgmr.msra.gmra.mrb[0].mxu1 %vm345_vm1, %v5219_v31  ;;  %v5297_v2 = vpop.f32.mrb[10].mxu0 }
  0xf4   :  { %v5299_v3 = vpop.f32.mrb[11].mxu0 }
  0xf5   :  { %v5319_v10 = vpack.i.bf16 %v5297_v2, %v5299_v3  ;;  %v5323_v11 = vpack.c.bf16 %v5297_v2, %v5299_v3 }
  0xf7   :  { %v5301_v4 = vpop.f32.mrb[12].mxu0 }
  0xf8   :  { %v5303_v5 = vpop.f32.mrb[13].mxu0 }
  0xf9   :  { %v5327_v12 = vpack.i.bf16 %v5301_v4, %v5303_v5  ;;  %v5331_v13 = vpack.c.bf16 %v5301_v4, %v5303_v5 }
  0xfb   :  { %v5305_v6 = vpop.f32.mrb[14].mxu0 }
  0xfc   :  { %v5307_v7 = vpop.f32.mrb[15].mxu0 }
  0xfd   :  { %v5335_v14 = vpack.i.bf16 %v5305_v6, %v5307_v7  ;;  %v5339_v18 = vpack.c.bf16 %v5305_v6, %v5307_v7 }
 0x155   :  { %v4809_v40 = vpop.permute.xlu0 %4808 }
 0x156   :  { %v4811_v41 = vunpack.i.h.bf16 %v4809_v40  ;;  %v4810_v42 = vunpack.i.l.bf16 %v4809_v40 }
 0x158   :  { %v4639_v44 = vpack.c.bf16 %v4811_v41, %v4810_v42 }
 0x159   :  { %v4814_v45 = vpop.permute.xlu0 %4813 }
 0x15a   :  { %v4816_v46 = vunpack.i.h.bf16 %v4814_v45  ;;  %v4815_v47 = vunpack.i.l.bf16 %v4814_v45  ;;  %4641 = vmatprep.subr.msk.bf16.mxu0 %vm5257_vm2, %v4639_v44 }
 0x15b   :  { %4644 = vmatpush3.bf16.xpose.msk.msra.mxu0 %vm5257_vm2, %v4639_v44 }
 0x15c   :  { %v4645_v48 = vpack.c.bf16 %v4816_v46, %v4815_v47 }
 0x15d   :  { %v4819_v49 = vpop.permute.xlu1 %4818 }
 0x15e   :  { %v4821_v50 = vunpack.i.h.bf16 %v4819_v49  ;;  %v4820_v51 = vunpack.i.l.bf16 %v4819_v49  ;;  %4647 = vmatprep.subr.msk.bf16.mxu0 %vm5257_vm2, %v4645_v48 }
 0x160   :  { %v4651_v52 = vpack.c.bf16 %v4821_v50, %v4820_v51 }
 0x161   :  { %v4824_v53 = vpop.permute.xlu1 %4823 }
 0x162   :  { %v4826_v54 = vunpack.i.h.bf16 %v4824_v53  ;;  %v4825_v55 = vunpack.i.l.bf16 %v4824_v53 }
 0x163   :  { %4650 = vmatpush3.bf16.xpose.msk.msra.mxu0 %vm5257_vm2, %v4645_v48 }
 0x164   :  { %4653 = vmatprep.subr.msk.bf16.mxu0 %vm5257_vm2, %v4651_v52  ;;  %v4657_v56 = vpack.c.bf16 %v4826_v54, %v4825_v55 }
 0x16b   :  { %4656 = vmatpush3.bf16.xpose.msk.msra.mxu0 %vm5257_vm2, %v4651_v52 }
 0x16c   :  { %4659 = vmatprep.subr.msk.bf16.mxu0 %vm5257_vm2, %v4657_v56 }
 0x173   :  { %4662 = vmatpush3.bf16.xpose.msk.msra.mxu0 %vm5257_vm2, %v4657_v56 }
 0x1c6   :  { %v4143_v59 = vpop.f32.mrb[0].mxu1 }
 0x1c7   :  { %v428_v60 = vmul.f32 %v4143_v59, %v5280_v57  ;;  %v418_v61 = vpop.f32.mrb[1].mxu1 }
 0x1c8   :  { %v427_v62 = vmul.f32 %v418_v61, %v5285_v58 }
 0x1ca   :  { %v5293_v1 = vpack.c.bf16 %v428_v60, %v427_v62  ;;  %4160 = vmatprep.mubr.msk.f32.mxu0 %vm61_vm0, %v427_v62 }
 0x1cb   :  { %4161 = vmatmul.mubr.msk.f32.vlgmr.msra.gmra.mrb[16].mxu0 %vm61_vm0, %v428_v60 }
 0x29e   :  { %v4162_v30 = vpop.f32.mrb[16].mxu0 }
 0x29f   :  { %v547_v32 = vadd.f32 %v4162_v30, %v260_v22  ;;  %v541_v33 = vpop.f32.mrb[17].mxu0 }
 0x2a0   :  { %v542_v34 = vadd.f32 %v541_v33, %v259_v26 }
 0x2a1   :  { %v553_v35 = vsel %vm345_vm1, %v547_v32, -inf }
 0x2a2   :  { %554 = vmax.xlane.f32.xlu1 %v553_v35  ;;  %v550_v36 = vsel %vm345_vm1, %v542_v34, -inf  ;;  %v270_v35 = vld [vmem:[%s6607_s6 + $0x8] sm:$0xff] }
 0x2a3   :  { %551 = vmax.xlane.f32.xlu0 %v550_v36 }
 0x2b3   :  { %4828 = vrot.lane.b32.xlu1 %v5174_v17, %s5054_s17 }
 0x2b7   :  { %4838 = vrot.lane.b32.xlu1 %v5198_v25, %s5054_s17 }
 0x2bb   :  { %4843 = vrot.lane.b32.xlu1 %v5210_v29, %s5054_s17 }
 0x32f   :  { %v555_v37 = vpop.xlane.xlu1 %554 }
 0x330   :  { %v557_v38 = vsub.f32 %v547_v32, %v555_v37  ;;  %v552_v39 = vpop.xlane.xlu0 %551 }
 0x331   :  { %v556_v40 = vsub.f32 %v542_v34, %v552_v39  ;;  %v269_v34 = vld [vmem:[%s6607_s6] sm:$0xff] }
 0x332   :  { %v560_v41 = vmul.f32 1.442695, %v557_v38  ;;  %v5388_v36 = vpack.c.bf16 %v270_v35, %v269_v34  ;;  %v263_v38 = vld [vmem:[%s6608_s5 + $0x10] sm:$0xff] }
 0x333   :  { %v558_v42 = vmul.f32 1.442695, %v556_v40  ;;  %v4829_v44 = vpop.permute.xlu1 %4828 }
 0x334   :  { %4887 = vpow2.f32 %v560_v41  ;;  %v4831_v45 = vunpack.i.h.bf16 %v4829_v44  ;;  %v4830_v46 = vunpack.i.l.bf16 %v4829_v44  ;;  %v264_v41 = vld [vmem:[%s6608_s5 + $0x18] sm:$0xff] }
 0x335   :  { %4889 = vpow2.f32 %v558_v42 }
 0x336   :  { %v5355_v47 = vpack.c.bf16 %v4831_v45, %v4830_v46  ;;  %v265_v45 = vld [vmem:[%s6608_s5 + $0x20] sm:$0xff] }
 0x337   :  { %v4839_v50 = vpop.permute.xlu1 %4838 }
 0x338   :  { %4664 = vmatprep.subr.bf16.mxu1 %v5355_v47  ;;  %v4841_v53 = vunpack.i.h.bf16 %v4839_v50  ;;  %v4840_v54 = vunpack.i.l.bf16 %v4839_v50  ;;  %v267_v50 = vld [vmem:[%s6608_s5 + $0x30] sm:$0xff] }
 0x339   :  { %4666 = vmatpush3.bf16.msra.mxu1 %v5355_v47 }
 0x33a   :  { %v5365_v61 = vpack.c.bf16 %v4841_v53, %v4840_v54 }
 0x33b   :  { %v4844_v59 = vpop.permute.xlu1 %4843 }
 0x33c   :  { %v4846_v62 = vunpack.i.h.bf16 %v4844_v59  ;;  %v4845_v22 = vunpack.i.l.bf16 %v4844_v59 }
 0x33e   :  { %v4888_v17 = vpop.eup %4887  ;;  %v5370_v30 = vpack.c.bf16 %v4846_v62, %v4845_v22 }
 0x33f   :  { %v565_v25 = vsel %vm345_vm1, %v4888_v17, 0.0  ;;  %v4890_v29 = vpop.eup %4889 }
 0x340   :  { %566 = vadd.xlane.f32.xlu0 %v565_v25  ;;  %v562_v48 = vsel %vm345_vm1, %v4890_v29, 0.0 }
 0x344   :  { %563 = vadd.xlane.f32.xlu0 %v562_v48 }
 0x35a   :  { %4833 = vrot.lane.b32.xlu0 %v5186_v21, %s5054_s17 }
 0x3cd   :  { %v567_v49 = vpop.xlane.xlu0 %566 }
 0x3d1   :  { %v564_v51 = vpop.xlane.xlu0 %563 }
 0x3d2   :  { %4891 = vrcp.f32 %v564_v51 }
 0x3d3   :  { %4893 = vrcp.f32 %v567_v49 }
 0x3d5   :  { %v4834_v52 = vpop.permute.xlu0 %4833 }
 0x3d6   :  { %v4836_v55 = vunpack.i.h.bf16 %v4834_v52  ;;  %v4835_v56 = vunpack.i.l.bf16 %v4834_v52 }
 0x3d8   :  { %v5363_v60 = vpack.c.bf16 %v4836_v55, %v4835_v56  ;;  %v268_v55 = vld [vmem:[%s6608_s5 + $0x38] sm:$0xff] }
 0x3da   :  { %4668 = vmatprep.subr.bf16.mxu1 %v5363_v60 }
 0x3db   :  { %4670 = vmatpush3.bf16.msra.mxu1 %v5363_v60 }
 0x3dc   :  { %v4892_v21 = vpop.eup %4891  ;;  %4672 = vmatprep.subr.bf16.mxu1 %v5365_v61 }
 0x3dd   :  { %v569_v26 = vmul.f32 %v4892_v21, %v4890_v29  ;;  %v4894_v32 = vpop.eup %4893  ;;  %v266_v29 = vld [vmem:[%s6608_s5 + $0x28] sm:$0xff] }
 0x3de   :  { %v571_v33 = vmul.f32 %v4894_v32, %v4888_v17 }
 0x3df   :  { %4674 = vmatpush3.bf16.msra.mxu1 %v5365_v61  ;;  %4179 = vmatprep.mubr.msk.f32.mxu1 %vm345_vm1, %v569_v26 }
 0x3e0   :  { %4676 = vmatprep.subr.bf16.mxu1 %v5370_v30 }
 0x3e3   :  { %4678 = vmatpush3.bf16.msra.mxu1 %v5370_v30 }
 0x3e4   :  { %4681 = vmatprep.subr.msk.bf16.mxu1 %vm5257_vm2, %v5293_v1 }
 0x3e6   :  { %4180 = vmatmul.mubr.msk.f32.vlgmr.msra.gmra.mrb[2].mxu1 %vm345_vm1, %v571_v33 }
 0x3e7   :  { %4186 = vmatprep.mubr.msk.f32.mxu1 %vm61_vm0, %v5170_v16 }
 0x3ec   :  { %4684 = vmatpush3.bf16.xpose.msk.msra.mxu1 %vm5257_vm2, %v5293_v1 }
 0x3ed   :  { %4686 = vmatprep.subr.bf16.mxu1 %v5388_v36 }
 0x3f3   :  { %4187 = vmatmul.mubr.msk.f32.vlgmr.msra.gmra.mrb[4].mxu1 %vm61_vm0, %v5168_v15 }
 0x3f4   :  { %4189 = vmatprep.mubr.msk.f32.mxu1 %vm61_vm0, %v5182_v20  ;;  %4688 = vmatpush3.bf16.msra.mxu1 %v5388_v36 }
 0x3f5   :  { %4690 = vmatprep.subr.bf16.mxu1 %v5355_v47 }
 0x3f7   :  { %4190 = vmatmul.mubr.msk.f32.gmra.mrb[6].mxu1 %vm61_vm0, %v5180_v19  ;;  %v262_v19 = vld [vmem:[%s6608_s5 + $0x8] sm:$0xff] }
 0x3f8   :  { %4192 = vmatprep.mubr.msk.f32.mxu1 %vm61_vm0, %v5194_v24 }
 0x3fb   :  { %4193 = vmatmul.mubr.msk.f32.gmra.mrb[8].mxu1 %vm61_vm0, %v5192_v23  ;;  %v261_v23 = vld [vmem:[%s6608_s5] sm:$0xff] }
 0x3fc   :  { %4195 = vmatprep.mubr.msk.f32.mxu1 %vm61_vm0, %v5206_v28 }
 0x3ff   :  { %4196 = vmatmul.mubr.msk.f32.gmra.mrb[10].mxu1 %vm61_vm0, %v5204_v27 }
 0x4b9   :  { %v4181_v15 = vpop.f32.mrb[2].mxu1 }
 0x4ba   :  { %v678_v16 = vmul.f32 %v4181_v15, %v5280_v57  ;;  %v668_v20 = vpop.f32.mrb[3].mxu1 }
 0x4bb   :  { %v677_v1 = vmul.f32 %v668_v20, %v5285_v58 }
 0x4bd   :  { %v4705_v37 = vpack.c.bf16 %v678_v16, %v677_v1 }
 0x4bf   :  { %4706 = vmatprep.subr.bf16.mxu0 %v4705_v37 }
 0x4c0   :  { %4708 = vmatpush3.bf16.msra.mxu0 %v4705_v37 }
 0x4c1   :  { %4710 = vmatprep.subr.bf16.mxu0 %v5311_v8 }
 0x4c6   :  { %v4188_v24 = vpop.f32.mrb[4].mxu1 }
 0x4c7   :  { %v767_v27 = vadd.f32 %v4188_v24, %v262_v19  ;;  %v761_v28 = vpop.f32.mrb[5].mxu1 }
 0x4c8   :  { %v762_v57 = vadd.f32 %v761_v28, %v261_v23 }
 0x4c9   :  { %v804_v58 = vsel %vm800_vm3, %v767_v27, -inf }
 0x4ca   :  { %805 = vmax.xlane.f32.xlu1 %v804_v58  ;;  %v4191_v39 = vpop.f32.mrb[6].mxu1  ;;  %v801_v40 = vsel %vm800_vm3, %v762_v57, -inf }
 0x4cb   :  { %v771_v42 = vpop.f32.mrb[7].mxu1  ;;  %802 = vmax.xlane.f32.xlu0 %v801_v40  ;;  %v777_v46 = vadd.f32 %v4191_v39, %v264_v41 }
 0x4cc   :  { %v772_v44 = vadd.f32 %v771_v42, %v263_v38 }
 0x4cd   :  { %v810_v54 = vsel %vm800_vm3, %v777_v46, -inf }
 0x4ce   :  { %v4194_v17 = vpop.f32.mrb[8].mxu1  ;;  %v807_v25 = vsel %vm800_vm3, %v772_v44, -inf }
 0x4cf   :  { %v781_v48 = vpop.f32.mrb[9].mxu1  ;;  %808 = vmax.xlane.f32.xlu0 %v807_v25  ;;  %v787_v51 = vadd.f32 %v4194_v17, %v266_v29 }
 0x4d0   :  { %v782_v49 = vadd.f32 %v781_v48, %v265_v45 }
 0x4d1   :  { %v816_v21 = vsel %vm800_vm3, %v787_v51, -inf }
 0x4d2   :  { %v4197_v52 = vpop.f32.mrb[10].mxu1  ;;  %v813_v53 = vsel %vm800_vm3, %v782_v49, -inf }
 0x4d3   :  { %v791_v56 = vpop.f32.mrb[11].mxu1  ;;  %814 = vmax.xlane.f32.xlu1 %v813_v53  ;;  %811 = vmax.xlane.f32.xlu0 %v810_v54  ;;  %v797_v62 = vadd.f32 %v4197_v52, %v268_v55 }
 0x4d4   :  { %v792_v59 = vadd.f32 %v791_v56, %v267_v50 }
 0x4d5   :  { %v822_v26 = vsel %vm800_vm3, %v797_v62, -inf }
 0x4d6   :  { %v819_v22 = vsel %vm800_vm3, %v792_v59, -inf }
 0x4d7   :  { %820 = vmax.xlane.f32.xlu1 %v819_v22  ;;  %817 = vmax.xlane.f32.xlu0 %v816_v21  ;;  %v274_v21 = vld [vmem:[%s6609_s7 + $0x18] sm:$0xff] }
 0x4db   :  { %823 = vmax.xlane.f32.xlu0 %v822_v26 }
 0x4e8   :  { %4848 = vrot.lane.b32.xlu1 %v5315_v9, %s5053_s28 }
 0x4ec   :  { %4858 = vrot.lane.b32.xlu1 %v5327_v12, %s5053_s28 }
 0x4f0   :  { %4863 = vrot.lane.b32.xlu1 %v5335_v14, %s5053_s28 }
 0x4f1   :  { %4853 = vrot.lane.b32.xlu0 %v5319_v10, %s5053_s28 }
 0x557   :  { %v806_v32 = vpop.xlane.xlu1 %805 }
 0x558   :  { %v826_v33 = vsub.f32 %v767_v27, %v806_v32  ;;  %v803_v34 = vpop.xlane.xlu0 %802  ;;  %v275_v32 = vld [vmem:[%s6609_s7 + $0x20] sm:$0xff] }
 0x559   :  { %v825_v35 = vsub.f32 %v762_v57, %v803_v34 }
 0x55a   :  { %v835_v15 = vmul.f32 1.442695, %v826_v33 }
 0x55b   :  { %v833_v16 = vmul.f32 1.442695, %v825_v35  ;;  %v276_v35 = vld [vmem:[%s6609_s7 + $0x28] sm:$0xff] }
 0x55c   :  { %v809_v20 = vpop.xlane.xlu0 %808 }
 0x55d   :  { %4895 = vpow2.f32 %v833_v16  ;;  %v827_v1 = vsub.f32 %v772_v44, %v809_v20  ;;  %v278_v20 = vld [vmem:[%s6609_s7 + $0x38] sm:$0xff] }
 0x55e   :  { %4897 = vpow2.f32 %v835_v15  ;;  %v277_v15 = vld [vmem:[%s6609_s7 + $0x30] sm:$0xff] }
 0x55f   :  { %v837_v37 = vmul.f32 1.442695, %v827_v1 }
 0x560   :  { %v815_v19 = vpop.xlane.xlu1 %814  ;;  %v812_v23 = vpop.xlane.xlu0 %811 }
 0x561   :  { %4899 = vpow2.f32 %v837_v37  ;;  %v829_v24 = vsub.f32 %v782_v49, %v815_v19  ;;  %v828_v28 = vsub.f32 %v777_v46, %v812_v23  ;;  %v279_v37 = vld [vmem:[%s6609_s7 + $0x40] sm:$0xff] }
 0x563   :  { %v841_v58 = vmul.f32 1.442695, %v829_v24  ;;  %v839_v38 = vmul.f32 1.442695, %v828_v28  ;;  %v280_v24 = vld [vmem:[%s6609_s7 + $0x48] sm:$0xff]  ;;  %v281_v28 = vld [vmem:[%s6609_s7 + $0x50] sm:$0xff] }
 0x564   :  { %v821_v39 = vpop.xlane.xlu1 %820  ;;  %v818_v40 = vpop.xlane.xlu0 %817 }
 0x565   :  { %4901 = vpow2.f32 %v841_v58  ;;  %v831_v27 = vsub.f32 %v792_v59, %v821_v39  ;;  %v830_v41 = vsub.f32 %v787_v51, %v818_v40  ;;  %v283_v39 = vld [vmem:[%s6609_s7 + $0x60] sm:$0xff]  ;;  %v284_v40 = vld [vmem:[%s6609_s7 + $0x68] sm:$0xff] }
 0x566   :  { %4903 = vpow2.f32 %v839_v38  ;;  %v282_v38 = vld [vmem:[%s6609_s7 + $0x58] sm:$0xff] }
 0x567   :  { %v5453_v57 = vpop.eup %4895  ;;  %v845_v42 = vmul.f32 1.442695, %v831_v27  ;;  %v843_v45 = vmul.f32 1.442695, %v830_v41  ;;  %v285_v27 = vld [vmem:[%s6609_s7 + $0x70] sm:$0xff]  ;;  %v286_v41 = vld [vmem:[%s6609_s7 + $0x78] sm:$0xff] }
 0x568   :  { %v5455_v44 = vpop.eup %4897  ;;  %4202 = vmatprep.mubr.msk.f32.mxu1 %vm800_vm3, %v5453_v57  ;;  %v824_v17 = vpop.xlane.xlu0 %823 }
 0x569   :  { %4905 = vpow2.f32 %v845_v42  ;;  %v832_v46 = vsub.f32 %v797_v62, %v824_v17  ;;  %4203 = vmatmul.mubr.msk.f32.vlgmr.msra.gmra.mrb[12].mxu1 %vm800_vm3, %v5455_v44  ;;  %v4849_v48 = vpop.permute.xlu1 %4848  ;;  %v273_v62 = vld [vmem:[%s6609_s7 + $0x10] sm:$0xff]  ;;  %v287_v42 = vld [vmem:[%s6609_s7 + $0x80] sm:$0xff] }
 0x56a   :  { %4907 = vpow2.f32 %v843_v45  ;;  %4692 = vmatpush3.bf16.msra.mxu1 %v5355_v47  ;;  %v4851_v51 = vunpack.i.h.bf16 %v4849_v48  ;;  %v4850_v47 = vunpack.i.l.bf16 %v4849_v48  ;;  %v288_v45 = vld [vmem:[%s6609_s7 + $0x88] sm:$0xff]  ;;  %v289_v17 = vld [vmem:[%s6609_s7 + $0x90] sm:$0xff] }
 0x56b   :  { %v5462_v25 = vpop.eup %4899  ;;  %v847_v29 = vmul.f32 1.442695, %v832_v46  ;;  %4694 = vmatprep.subr.bf16.mxu1 %v5363_v60  ;;  %v290_v46 = vld [vmem:[%s6609_s7 + $0x98] sm:$0xff]  ;;  %v292_v48 = vld [vmem:[%s6609_s7 + $0xa8] sm:$0xff] }
 0x56c   :  { %4205 = vmatprep.mubr.msk.f32.mxu1 %vm800_vm3, %v5462_v25  ;;  %v4725_v53 = vpack.c.bf16 %v4851_v51, %v4850_v47  ;;  %v4854_v55 = vpop.permute.xlu0 %4853  ;;  %v293_v51 = vld [vmem:[%s6609_s7 + $0xb0] sm:$0xff]  ;;  %v294_v47 = vld [vmem:[%s6609_s7 + $0xb8] sm:$0xff] }
 0x56d   :  { %4909 = vpow2.f32 %v847_v29  ;;  %v4856_v56 = vunpack.i.h.bf16 %v4854_v55  ;;  %v4855_v59 = vunpack.i.l.bf16 %v4854_v55  ;;  %v4859_v26 = vpop.permute.xlu1 %4858  ;;  %v291_v29 = vld [vmem:[%s6609_s7 + $0xa0] sm:$0xff]  ;;  %v296_v55 = vld [vmem:[%s6609_s7 + $0xc8] sm:$0xff] }
 0x56e   :  { %4696 = vmatpush3.bf16.msra.mxu1 %v5363_v60  ;;  %v4861_v33 = vunpack.i.h.bf16 %v4859_v26  ;;  %v4860_v34 = vunpack.i.l.bf16 %v4859_v26  ;;  %v304_v26 = vld [vmem:[%s6609_s7 + $0x108] sm:$0xff] }
 0x56f   :  { %v5468_v49 = vpop.eup %4901  ;;  %4698 = vmatprep.subr.bf16.mxu1 %v5365_v61  ;;  %v4731_v22 = vpack.c.bf16 %v4856_v56, %v4855_v59  ;;  %v298_v56 = vld [vmem:[%s6609_s7 + $0xd8] sm:$0xff]  ;;  %v299_v59 = vld [vmem:[%s6609_s7 + $0xe0] sm:$0xff] }
 0x570   :  { %v5471_v50 = vpop.eup %4903  ;;  %v4737_v16 = vpack.c.bf16 %v4861_v33, %v4860_v34  ;;  %v306_v33 = vld [vmem:[%s6609_s7 + $0x118] sm:$0xff]  ;;  %v307_v34 = vld [vmem:[%s6609_s7 + $0x120] sm:$0xff] }
 0x571   :  { %4206 = vmatmul.mubr.msk.f32.gmra.mrb[14].mxu1 %vm800_vm3, %v5471_v50  ;;  %v4864_v1 = vpop.permute.xlu1 %4863 }
 0x572   :  { %4208 = vmatprep.mubr.msk.f32.mxu1 %vm800_vm3, %v5468_v49  ;;  %4700 = vmatpush3.bf16.msra.mxu1 %v5365_v61  ;;  %v271_v61 = vld [vmem:[%s6609_s7] sm:$0xff]  ;;  %v4866_v19 = vunpack.i.h.bf16 %v4864_v1  ;;  %v4865_v23 = vunpack.i.l.bf16 %v4864_v1  ;;  %v312_v1 = vld [vmem:[%s6609_s7 + $0x148] sm:$0xff] }
 0x573   :  { %v5478_v52 = vpop.eup %4905  ;;  %4702 = vmatprep.subr.bf16.mxu1 %v5370_v30 }
 0x574   :  { %v5481_v60 = vpop.eup %4907  ;;  %v4743_v58 = vpack.c.bf16 %v4866_v19, %v4865_v23  ;;  %v314_v19 = vld [vmem:[%s6609_s7 + $0x158] sm:$0xff]  ;;  %v315_v23 = vld [vmem:[%s6609_s7 + $0x160] sm:$0xff] }
 0x575   :  { %4209 = vmatmul.mubr.msk.f32.gmra.mrb[16].mxu1 %vm800_vm3, %v5481_v60 }
 0x576   :  { %4211 = vmatprep.mubr.msk.f32.mxu1 %vm800_vm3, %v5478_v52  ;;  %4704 = vmatpush3.bf16.msra.mxu1 %v5370_v30  ;;  %v272_v30 = vld [vmem:[%s6609_s7 + $0x8] sm:$0xff] }
 0x577   :  { %v5488_v54 = vpop.eup %4909  ;;  %4727 = vmatprep.subr.msk.bf16.mxu1 %vm5257_vm2, %v4725_v53 }
 0x579   :  { %4212 = vmatmul.mubr.msk.f32.gmra.mrb[18].mxu1 %vm800_vm3, %v5488_v54 }
 0x57a   :  { %4230 = vmatprep.mubr.msk.f32.mxu1 %vm345_vm1, %v271_v61  ;;  %v297_v61 = vld [vmem:[%s6609_s7 + $0xd0] sm:$0xff] }
 0x57d   :  { %4231 = vmatmul.mubr.msk.f32.vlgmr.msra.gmra.mrb[20].mxu1 %vm345_vm1, %v272_v30  ;;  %v300_v30 = vld [vmem:[%s6609_s7 + $0xe8] sm:$0xff] }
 0x57e   :  { %4233 = vmatprep.mubr.msk.f32.mxu1 %vm345_vm1, %v273_v62  ;;  %v301_v62 = vld [vmem:[%s6609_s7 + $0xf0] sm:$0xff] }
 0x57f   :  { %4730 = vmatpush3.bf16.xpose.msk.msra.mxu1 %vm5257_vm2, %v4725_v53  ;;  %v295_v53 = vld [vmem:[%s6609_s7 + $0xc0] sm:$0xff] }
 0x580   :  { %4733 = vmatprep.subr.msk.bf16.mxu1 %vm5257_vm2, %v4731_v22 }
 0x581   :  { %4234 = vmatmul.mubr.msk.f32.gmra.mrb[22].mxu1 %vm345_vm1, %v274_v21  ;;  %v303_v21 = vld [vmem:[%s6609_s7 + $0x100] sm:$0xff] }
 0x582   :  { %4236 = vmatprep.mubr.msk.f32.mxu1 %vm345_vm1, %v275_v32  ;;  %v305_v32 = vld [vmem:[%s6609_s7 + $0x110] sm:$0xff] }
 0x585   :  { %4237 = vmatmul.mubr.msk.f32.gmra.mrb[24].mxu1 %vm345_vm1, %v276_v35  ;;  %v308_v35 = vld [vmem:[%s6609_s7 + $0x128] sm:$0xff] }
 0x586   :  { %4239 = vmatprep.mubr.msk.f32.mxu1 %vm345_vm1, %v277_v15  ;;  %v309_v15 = vld [vmem:[%s6609_s7 + $0x130] sm:$0xff] }
 0x587   :  { %4736 = vmatpush3.bf16.xpose.msk.msra.mxu1 %vm5257_vm2, %v4731_v22  ;;  %v302_v22 = vld [vmem:[%s6609_s7 + $0xf8] sm:$0xff] }
 0x588   :  { %4739 = vmatprep.subr.msk.bf16.mxu1 %vm5257_vm2, %v4737_v16 }
 0x589   :  { %4240 = vmatmul.mubr.msk.f32.gmra.mrb[26].mxu1 %vm345_vm1, %v278_v20  ;;  %v311_v20 = vld [vmem:[%s6609_s7 + $0x140] sm:$0xff] }
 0x58a   :  { %4242 = vmatprep.mubr.msk.f32.mxu1 %vm345_vm1, %v279_v37  ;;  %v313_v37 = vld [vmem:[%s6609_s7 + $0x150] sm:$0xff] }
 0x58d   :  { %4243 = vmatmul.mubr.msk.f32.gmra.mrb[28].mxu1 %vm345_vm1, %v280_v24  ;;  %v316_v24 = vld [vmem:[%s6609_s7 + $0x168] sm:$0xff] }
 0x58e   :  { %4245 = vmatprep.mubr.msk.f32.mxu1 %vm345_vm1, %v281_v28  ;;  %v317_v28 = vld [vmem:[%s6609_s7 + $0x170] sm:$0xff] }
 0x58f   :  { %4742 = vmatpush3.bf16.xpose.msk.msra.mxu1 %vm5257_vm2, %v4737_v16  ;;  %v310_v16 = vld [vmem:[%s6609_s7 + $0x138] sm:$0xff] }
 0x590   :  { %4745 = vmatprep.subr.msk.bf16.mxu1 %vm5257_vm2, %v4743_v58 }
 0x591   :  { %4246 = vmatmul.mubr.msk.f32.gmra.mrb[30].mxu1 %vm345_vm1, %v282_v38  ;;  %v319_v38 = vld [vmem:[%s6609_s7 + $0x180] sm:$0xff] }
 0x592   :  { %4248 = vmatprep.mubr.msk.f32.mxu1 %vm345_vm1, %v283_v39  ;;  %v320_v39 = vld [vmem:[%s6609_s7 + $0x188] sm:$0xff] }
 0x595   :  { %4249 = vmatmul.mubr.msk.f32.gmra.mrb[32].mxu1 %vm345_vm1, %v284_v40  ;;  %v321_v40 = vld [vmem:[%s6609_s7 + $0x190] sm:$0xff] }
 0x596   :  { %4251 = vmatprep.mubr.msk.f32.mxu1 %vm345_vm1, %v285_v27  ;;  %v322_v27 = vld [vmem:[%s6609_s7 + $0x198] sm:$0xff] }
 0x597   :  { %4748 = vmatpush3.bf16.xpose.msk.msra.mxu1 %vm5257_vm2, %v4743_v58  ;;  %v318_v58 = vld [vmem:[%s6609_s7 + $0x178] sm:$0xff] }
 0x599   :  { %4252 = vmatmul.mubr.msk.f32.gmra.mrb[34].mxu1 %vm345_vm1, %v286_v41  ;;  %v323_v41 = vld [vmem:[%s6609_s7 + $0x1a0] sm:$0xff] }
 0x59a   :  { %4254 = vmatprep.mubr.msk.f32.mxu1 %vm345_vm1, %v287_v42  ;;  %v324_v42 = vld [vmem:[%s6609_s7 + $0x1a8] sm:$0xff] }
 0x59d   :  { %4255 = vmatmul.mubr.msk.f32.gmra.mrb[36].mxu1 %vm345_vm1, %v288_v45  ;;  %v325_v45 = vld [vmem:[%s6609_s7 + $0x1b0] sm:$0xff] }
 0x59e   :  { %4257 = vmatprep.mubr.msk.f32.mxu1 %vm345_vm1, %v289_v17  ;;  %v326_v17 = vld [vmem:[%s6609_s7 + $0x1b8] sm:$0xff] }
 0x5a1   :  { %4258 = vmatmul.mubr.msk.f32.gmra.mrb[38].mxu1 %vm345_vm1, %v290_v46  ;;  %v327_v46 = vld [vmem:[%s6609_s7 + $0x1c0] sm:$0xff] }
 0x5a2   :  { %4260 = vmatprep.mubr.msk.f32.mxu1 %vm345_vm1, %v291_v29  ;;  %v328_v29 = vld [vmem:[%s6609_s7 + $0x1c8] sm:$0xff] }
 0x5a5   :  { %4261 = vmatmul.mubr.msk.f32.gmra.mrb[40].mxu1 %vm345_vm1, %v292_v48  ;;  %v329_v48 = vld [vmem:[%s6609_s7 + $0x1d0] sm:$0xff] }
 0x5a6   :  { %4263 = vmatprep.mubr.msk.f32.mxu1 %vm345_vm1, %v293_v51  ;;  %v330_v51 = vld [vmem:[%s6609_s7 + $0x1d8] sm:$0xff] }
 0x5a9   :  { %4264 = vmatmul.mubr.msk.f32.gmra.mrb[42].mxu1 %vm345_vm1, %v294_v47  ;;  %v331_v47 = vld [vmem:[%s6609_s7 + $0x1e0] sm:$0xff] }
 0x5aa   :  { %4266 = vmatprep.mubr.msk.f32.mxu1 %vm345_vm1, %v295_v53  ;;  %v332_v53 = vld [vmem:[%s6609_s7 + $0x1e8] sm:$0xff] }
 0x5ad   :  { %4267 = vmatmul.mubr.msk.f32.gmra.mrb[44].mxu1 %vm345_vm1, %v296_v55  ;;  %v333_v55 = vld [vmem:[%s6609_s7 + $0x1f0] sm:$0xff] }
 0x5ae   :  { %4269 = vmatprep.mubr.msk.f32.mxu1 %vm345_vm1, %v297_v61  ;;  %v334_v61 = vld [vmem:[%s6609_s7 + $0x1f8] sm:$0xff] }
 0x5b1   :  { %4270 = vmatmul.mubr.msk.f32.gmra.mrb[46].mxu1 %vm345_vm1, %v298_v56  ;;  %v335_v56 = vld [vmem:[%s6609_s7 + $0x200] sm:$0xff] }
 0x5b2   :  { %4272 = vmatprep.mubr.msk.f32.mxu1 %vm345_vm1, %v299_v59  ;;  %v336_v59 = vld [vmem:[%s6609_s7 + $0x208] sm:$0xff] }
 0x5b5   :  { %4273 = vmatmul.mubr.msk.f32.gmra.mrb[48].mxu1 %vm345_vm1, %v300_v30  ;;  %v337_v30 = vld [vmem:[%s6609_s7 + $0x210] sm:$0xff] }
 0x5b6   :  { %4275 = vmatprep.mubr.msk.f32.mxu1 %vm345_vm1, %v301_v62  ;;  %v338_v62 = vld [vmem:[%s6609_s7 + $0x218] sm:$0xff] }
 0x5b9   :  { %4276 = vmatmul.mubr.msk.f32.gmra.mrb[50].mxu1 %vm345_vm1, %v302_v22  ;;  %v339_v22 = vld [vmem:[%s6609_s7 + $0x220] sm:$0xff] }
 0x5ba   :  { %4278 = vmatprep.mubr.msk.f32.mxu1 %vm345_vm1, %v303_v21  ;;  %v340_v21 = vld [vmem:[%s6609_s7 + $0x228] sm:$0xff] }
 0x5bd   :  { %4279 = vmatmul.mubr.msk.f32.gmra.mrb[52].mxu1 %vm345_vm1, %v304_v26  ;;  %v341_v26 = vld [vmem:[%s6609_s7 + $0x230] sm:$0xff] }
 0x5be   :  { %4281 = vmatprep.mubr.msk.f32.mxu1 %vm345_vm1, %v305_v32  ;;  %v342_v32 = vld [vmem:[%s6609_s7 + $0x238] sm:$0xff] }
 0x5c1   :  { %4282 = vmatmul.mubr.msk.f32.gmra.mrb[54].mxu1 %vm345_vm1, %v306_v33 }
 0x5c2   :  { %4284 = vmatprep.mubr.msk.f32.mxu1 %vm345_vm1, %v307_v34 }
 0x5c5   :  { %4285 = vmatmul.mubr.msk.f32.gmra.mrb[56].mxu1 %vm345_vm1, %v308_v35 }
 0x5c6   :  { %4287 = vmatprep.mubr.msk.f32.mxu1 %vm345_vm1, %v309_v15 }
 0x5c9   :  { %4288 = vmatmul.mubr.msk.f32.gmra.mrb[58].mxu1 %vm345_vm1, %v310_v16 }
 0x5ca   :  { %4290 = vmatprep.mubr.msk.f32.mxu1 %vm345_vm1, %v311_v20 }
 0x5cd   :  { %4291 = vmatmul.mubr.msk.f32.gmra.mrb[60].mxu1 %vm345_vm1, %v312_v1 }
 0x5ce   :  { %4293 = vmatprep.mubr.msk.f32.mxu1 %vm345_vm1, %v313_v37 }
 0x5d1   :  { %4294 = vmatmul.mubr.msk.f32.gmra.mrb[62].mxu1 %vm345_vm1, %v314_v19 }
 0x5d2   :  { %4296 = vmatprep.mubr.msk.f32.mxu1 %vm345_vm1, %v315_v23 }
 0x5d5   :  { %4297 = vmatmul.mubr.msk.f32.gmra.mrb[64].mxu1 %vm345_vm1, %v316_v24 }
 0x5d6   :  { %4299 = vmatprep.mubr.msk.f32.mxu1 %vm345_vm1, %v317_v28 }
 0x5d9   :  { %4300 = vmatmul.mubr.msk.f32.gmra.mrb[66].mxu1 %vm345_vm1, %v318_v58 }
 0x5da   :  { %4302 = vmatprep.mubr.msk.f32.mxu1 %vm345_vm1, %v319_v38  ;;  %v1635_v38 = vlaneseq }
 0x5dd   :  { %4303 = vmatmul.mubr.msk.f32.gmra.mrb[68].mxu1 %vm345_vm1, %v320_v39 }
 0x5de   :  { %4305 = vmatprep.mubr.msk.f32.mxu1 %vm345_vm1, %v321_v40 }
 0x5e1   :  { %4306 = vmatmul.mubr.msk.f32.gmra.mrb[70].mxu1 %vm345_vm1, %v322_v27 }
 0x5e2   :  { %4308 = vmatprep.mubr.msk.f32.mxu1 %vm345_vm1, %v323_v41 }
 0x5e5   :  { %4309 = vmatmul.mubr.msk.f32.gmra.mrb[72].mxu1 %vm345_vm1, %v324_v42 }
 0x5e6   :  { %4311 = vmatprep.mubr.msk.f32.mxu1 %vm345_vm1, %v325_v45 }
 0x5e9   :  { %4312 = vmatmul.mubr.msk.f32.gmra.mrb[74].mxu1 %vm345_vm1, %v326_v17 }
 0x5ea   :  { %4314 = vmatprep.mubr.msk.f32.mxu1 %vm345_vm1, %v327_v46 }
 0x5ed   :  { %4315 = vmatmul.mubr.msk.f32.gmra.mrb[76].mxu1 %vm345_vm1, %v328_v29 }
 0x5ee   :  { %4317 = vmatprep.mubr.msk.f32.mxu1 %vm345_vm1, %v329_v48  ;;  %v5820_v48 = vld [vmem:[%s6610_s8] sm:$0xff] }
 0x5f1   :  { %4318 = vmatmul.mubr.msk.f32.gmra.mrb[78].mxu1 %vm345_vm1, %v330_v51 }
 0x5f2   :  { %4320 = vmatprep.mubr.msk.f32.mxu1 %vm345_vm1, %v331_v47 }
 0x5f5   :  { %4321 = vmatmul.mubr.msk.f32.gmra.mrb[80].mxu1 %vm345_vm1, %v332_v53 }
 0x5f6   :  { %4323 = vmatprep.mubr.msk.f32.mxu1 %vm345_vm1, %v333_v55 }
 0x5f9   :  { %4324 = vmatmul.mubr.msk.f32.gmra.mrb[82].mxu1 %vm345_vm1, %v334_v61  ;;  %v4967_v61 = vld [vmem:[%s6604_s2] sm:$0xff] }
 0x5fa   :  { %4326 = vmatprep.mubr.msk.f32.mxu1 %vm345_vm1, %v335_v56 }
 0x5fd   :  { %4327 = vmatmul.mubr.msk.f32.gmra.mrb[84].mxu1 %vm345_vm1, %v336_v59 }
 0x5fe   :  { %4329 = vmatprep.mubr.msk.f32.mxu1 %vm345_vm1, %v337_v30 }
 0x601   :  { %4330 = vmatmul.mubr.msk.f32.gmra.mrb[86].mxu1 %vm345_vm1, %v338_v62 }
 0x602   :  { %4332 = vmatprep.mubr.msk.f32.mxu1 %vm345_vm1, %v339_v22 }
 0x605   :  { %4333 = vmatmul.mubr.msk.f32.gmra.mrb[88].mxu1 %vm345_vm1, %v340_v21 }
 0x606   :  { %4335 = vmatprep.mubr.msk.f32.mxu1 %vm345_vm1, %v341_v26 }
 0x609   :  { %4336 = vmatmul.mubr.msk.f32.gmra.mrb[90].mxu1 %vm345_vm1, %v342_v32 }
 0x63c   :  { %v4204_v33 = vpop.f32.mrb[12].mxu1 }
 0x63d   :  { %4911 = vrcp.f32 %v4204_v33  ;;  %v939_v34 = vpop.f32.mrb[13].mxu1 }
 0x63e   :  { %4913 = vrcp.f32 %v939_v34 }
 0x644   :  { %v4207_v35 = vpop.f32.mrb[14].mxu1 }
 0x645   :  { %4915 = vrcp.f32 %v4207_v35  ;;  %v949_v15 = vpop.f32.mrb[15].mxu1 }
 0x646   :  { %4917 = vrcp.f32 %v949_v15 }
 0x647   :  { %v4912_v16 = vpop.eup %4911 }
 0x648   :  { %v4914_v20 = vpop.eup %4913  ;;  %v4210_v1 = vpop.f32.mrb[16].mxu1  ;;  %v981_v23 = vmul.f32 %v4912_v16, %v5455_v44 }
 0x649   :  { %4919 = vrcp.f32 %v4210_v1  ;;  %v959_v37 = vpop.f32.mrb[17].mxu1  ;;  %v979_v19 = vmul.f32 %v4914_v20, %v5453_v57 }
 0x64a   :  { %4921 = vrcp.f32 %v959_v37 }
 0x64b   :  { %4342 = vmatprep.mubr.msk.f32.mxu0 %vm800_vm3, %v979_v19 }
 0x64c   :  { %v4213_v24 = vpop.f32.mrb[18].mxu1  ;;  %4343 = vmatmul.mubr.msk.f32.vlgmr.msra.gmra.mrb[18].mxu0 %vm800_vm3, %v981_v23 }
 0x64d   :  { %4923 = vrcp.f32 %v4213_v24  ;;  %v969_v28 = vpop.f32.mrb[19].mxu1  ;;  %4712 = vmatpush3.bf16.msra.mxu0 %v5311_v8  ;;  %v5807_v8 = vshrl.u32 %v1635_v38, 7 }
 0x64e   :  { %4925 = vrcp.f32 %v969_v28  ;;  %4714 = vmatprep.subr.bf16.mxu0 %v5323_v11 }
 0x64f   :  { %v4916_v58 = vpop.eup %4915  ;;  %v1669_v28 = vsub.s32 2, %v5807_v8 }
 0x650   :  { %v4918_v39 = vpop.eup %4917  ;;  %v4232_v40 = vpop.f32.mrb[20].mxu1  ;;  %v985_v27 = vmul.f32 %v4916_v58, %v5471_v50  ;;  %v1637_v50 = vsub.s32 0, %v5807_v8 }
 0x651   :  { %4716 = vmatpush3.bf16.msra.mxu0 %v5323_v11  ;;  %v983_v57 = vmul.f32 %v4918_v39, %v5462_v25  ;;  %v1276_v44 = vpop.f32.mrb[21].mxu1 }
 0x652   :  { %4718 = vmatprep.subr.bf16.mxu0 %v5331_v13  ;;  %v5828_v53 = vrot.slane %v5820_v48, %v1637_v50 }
 0x653   :  { %v4920_v41 = vpop.eup %4919  ;;  %4345 = vmatprep.mubr.msk.f32.mxu0 %vm800_vm3, %v983_v57 }
 0x654   :  { %v4922_v42 = vpop.eup %4921  ;;  %4346 = vmatmul.mubr.msk.f32.gmra.mrb[20].mxu0 %vm800_vm3, %v985_v27  ;;  %v4235_v45 = vpop.f32.mrb[22].mxu1  ;;  %v989_v25 = vmul.f32 %v4920_v41, %v5481_v60  ;;  %v1649_v60 = vsub.s32 1, %v5807_v8  ;;  %v1639_v56 = vmul.f32 %v5828_v53, %v1276_v44 }
 0x655   :  { %4720 = vmatpush3.bf16.msra.mxu0 %v5331_v13  ;;  %v987_v11 = vmul.f32 %v4922_v42, %v5468_v49  ;;  %v1286_v17 = vpop.f32.mrb[23].mxu1  ;;  %v1642_v21 = vmul.f32 %v4235_v45, %v5828_v53  ;;  %v5857_v42 = vrot.slane %v5820_v48, %v1669_v28 }
 0x656   :  { %4722 = vmatprep.subr.bf16.mxu0 %v5339_v18  ;;  %v1641_v32 = vmul.f32 %v5828_v53, %v1286_v17 }
 0x657   :  { %v4924_v46 = vpop.eup %4923  ;;  %4348 = vmatprep.mubr.msk.f32.mxu0 %vm800_vm3, %v987_v11 }
 0x658   :  { %v4926_v29 = vpop.eup %4925  ;;  %4349 = vmatmul.mubr.msk.f32.gmra.mrb[22].mxu0 %vm800_vm3, %v989_v25  ;;  %v4238_v13 = vpop.f32.mrb[24].mxu1  ;;  %v993_v47 = vmul.f32 %v4924_v46, %v5488_v54  ;;  %v1640_v54 = vmul.f32 %v4232_v40, %v5828_v53 }
 0x659   :  { %4724 = vmatpush3.bf16.msra.mxu0 %v5339_v18  ;;  %v991_v49 = vmul.f32 %v4926_v29, %v5478_v52  ;;  %v1296_v51 = vpop.f32.mrb[25].mxu1  ;;  %v5836_v52 = vrot.slane %v5820_v48, %v1649_v60  ;;  %v1644_v16 = vmul.f32 %v4238_v13, %v5828_v53 }
 0x65a   :  { %v1643_v1 = vmul.f32 %v5828_v53, %v1296_v51 }
 0x65b   :  { %4351 = vmatprep.mubr.msk.f32.mxu0 %vm800_vm3, %v991_v49 }
 0x65c   :  { %4352 = vmatmul.mubr.msk.f32.gmra.mrb[24].mxu0 %vm800_vm3, %v993_v47  ;;  %v4241_v55 = vpop.f32.mrb[26].mxu1 }
 0x65d   :  { %4370 = vmatprep.mubr.msk.f32.mxu0 %vm345_vm1, %v4967_v61  ;;  %v1306_v18 = vpop.f32.mrb[27].mxu1  ;;  %v1646_v38 = vmul.f32 %v4241_v55, %v5828_v53 }
 0x65e   :  { %v1645_v40 = vmul.f32 %v5828_v53, %v1306_v18 }
 0x660   :  { %4371 = vmatmul.mubr.msk.f32.vlgmr.msra.gmra.mrb[26].mxu0 %vm345_vm1, %v5219_v31  ;;  %v4244_v59 = vpop.f32.mrb[28].mxu1 }
 0x661   :  { %v1652_v30 = vmul.f32 %v4244_v59, %v5836_v52  ;;  %v1316_v62 = vpop.f32.mrb[29].mxu1 }
 0x662   :  { %v1651_v22 = vmul.f32 %v5836_v52, %v1316_v62 }
 0x663   :  { %v1660_v26 = vadd.f32 %v1652_v30, %v1640_v54  ;;  %v1689_v30 = vsub.s32 3, %v5807_v8 }
 0x664   :  { %v1659_v33 = vadd.f32 %v1651_v22, %v1639_v56  ;;  %v4247_v34 = vpop.f32.mrb[30].mxu1 }
 0x665   :  { %v1654_v35 = vmul.f32 %v4247_v34, %v5836_v52  ;;  %v1326_v15 = vpop.f32.mrb[31].mxu1  ;;  %v5869_v34 = vrot.slane %v5820_v48, %v1689_v30 }
 0x666   :  { %v1653_v31 = vmul.f32 %v5836_v52, %v1326_v15 }
 0x667   :  { %v1662_v20 = vadd.f32 %v1654_v35, %v1642_v21 }
 0x668   :  { %v1661_v37 = vadd.f32 %v1653_v31, %v1641_v32  ;;  %v4250_v19 = vpop.f32.mrb[32].mxu1 }
 0x669   :  { %v1656_v23 = vmul.f32 %v4250_v19, %v5836_v52  ;;  %v1336_v24 = vpop.f32.mrb[33].mxu1 }
 0x66a   :  { %v1655_v58 = vmul.f32 %v5836_v52, %v1336_v24 }
 0x66b   :  { %v1664_v39 = vadd.f32 %v1656_v23, %v1644_v16 }
 0x66c   :  { %v1663_v57 = vadd.f32 %v1655_v58, %v1643_v1  ;;  %v4253_v44 = vpop.f32.mrb[34].mxu1 }
 0x66d   :  { %v1658_v27 = vmul.f32 %v4253_v44, %v5836_v52  ;;  %v1346_v41 = vpop.f32.mrb[35].mxu1 }
 0x66e   :  { %v1657_v45 = vmul.f32 %v5836_v52, %v1346_v41  ;;  %v1709_v41 = vsub.s32 4, %v5807_v8 }
 0x66f   :  { %v1666_v11 = vadd.f32 %v1658_v27, %v1646_v38 }
 0x670   :  { %v1665_v17 = vadd.f32 %v1657_v45, %v1645_v40  ;;  %v4256_v25 = vpop.f32.mrb[36].mxu1 }
 0x671   :  { %v1672_v46 = vmul.f32 %v4256_v25, %v5857_v42  ;;  %v1356_v50 = vpop.f32.mrb[37].mxu1 }
 0x672   :  { %v1671_v29 = vmul.f32 %v5857_v42, %v1356_v50 }
 0x673   :  { %v1680_v13 = vadd.f32 %v1672_v46, %v1660_v26 }
 0x674   :  { %v1679_v49 = vadd.f32 %v1671_v29, %v1659_v33  ;;  %v4259_v51 = vpop.f32.mrb[38].mxu1  ;;  %v5881_v29 = vrot.slane %v5820_v48, %v1709_v41 }
 0x675   :  { %v1674_v60 = vmul.f32 %v4259_v51, %v5857_v42  ;;  %v1366_v47 = vpop.f32.mrb[39].mxu1 }
 0x676   :  { %v1673_v55 = vmul.f32 %v5857_v42, %v1366_v47 }
 0x677   :  { %v1682_v61 = vadd.f32 %v1674_v60, %v1662_v20 }
 0x678   :  { %v1681_v18 = vadd.f32 %v1673_v55, %v1661_v37  ;;  %v4262_v54 = vpop.f32.mrb[40].mxu1 }
 0x679   :  { %v1676_v56 = vmul.f32 %v4262_v54, %v5857_v42  ;;  %v1376_v59 = vpop.f32.mrb[41].mxu1 }
 0x67a   :  { %v1675_v62 = vmul.f32 %v5857_v42, %v1376_v59 }
 0x67b   :  { %v1684_v22 = vadd.f32 %v1676_v56, %v1664_v39 }
 0x67c   :  { %v1683_v21 = vadd.f32 %v1675_v62, %v1663_v57  ;;  %v4265_v26 = vpop.f32.mrb[42].mxu1 }
 0x67d   :  { %v1678_v32 = vmul.f32 %v4265_v26, %v5857_v42  ;;  %v1386_v33 = vpop.f32.mrb[43].mxu1 }
 0x67e   :  { %v1677_v35 = vmul.f32 %v5857_v42, %v1386_v33 }
 0x67f   :  { %v1686_v15 = vadd.f32 %v1678_v32, %v1666_v11 }
 0x680   :  { %v1685_v31 = vadd.f32 %v1677_v35, %v1665_v17  ;;  %v4268_v16 = vpop.f32.mrb[44].mxu1  ;;  %v1729_v35 = vsub.s32 5, %v5807_v8 }
 0x681   :  { %v1692_v20 = vmul.f32 %v4268_v16, %v5869_v34  ;;  %v1396_v1 = vpop.f32.mrb[45].mxu1 }
 0x682   :  { %v1691_v37 = vmul.f32 %v5869_v34, %v1396_v1 }
 0x683   :  { %v1700_v19 = vadd.f32 %v1692_v20, %v1680_v13 }
 0x684   :  { %v1699_v23 = vadd.f32 %v1691_v37, %v1679_v49  ;;  %v4271_v24 = vpop.f32.mrb[46].mxu1 }
 0x685   :  { %v1694_v28 = vmul.f32 %v4271_v24, %v5869_v34  ;;  %v1406_v58 = vpop.f32.mrb[47].mxu1 }
 0x686   :  { %v1693_v38 = vmul.f32 %v5869_v34, %v1406_v58 }
 0x687   :  { %v1702_v39 = vadd.f32 %v1694_v28, %v1682_v61 }
 0x688   :  { %v1701_v40 = vadd.f32 %v1693_v38, %v1681_v18  ;;  %v4274_v57 = vpop.f32.mrb[48].mxu1 }
 0x689   :  { %v1696_v44 = vmul.f32 %v4274_v57, %v5869_v34  ;;  %v1416_v27 = vpop.f32.mrb[49].mxu1 }
 0x68a   :  { %v1695_v45 = vmul.f32 %v5869_v34, %v1416_v27 }
 0x68b   :  { %v1704_v11 = vadd.f32 %v1696_v44, %v1684_v22 }
 0x68c   :  { %v1703_v17 = vadd.f32 %v1695_v45, %v1683_v21  ;;  %v4277_v25 = vpop.f32.mrb[50].mxu1 }
 0x68d   :  { %v1698_v46 = vmul.f32 %v4277_v25, %v5869_v34  ;;  %v1426_v50 = vpop.f32.mrb[51].mxu1 }
 0x68e   :  { %v1697_v13 = vmul.f32 %v5869_v34, %v1426_v50 }
 0x68f   :  { %v1706_v49 = vadd.f32 %v1698_v46, %v1686_v15 }
 0x690   :  { %v1705_v51 = vadd.f32 %v1697_v13, %v1685_v31  ;;  %v4280_v60 = vpop.f32.mrb[52].mxu1 }
 0x691   :  { %v1712_v47 = vmul.f32 %v4280_v60, %v5881_v29  ;;  %v1436_v55 = vpop.f32.mrb[53].mxu1 }
 0x692   :  { %v1711_v61 = vmul.f32 %v5881_v29, %v1436_v55 }
 0x693   :  { %v1720_v18 = vadd.f32 %v1712_v47, %v1700_v19  ;;  %v5893_v19 = vrot.slane %v5820_v48, %v1729_v35 }
 0x694   :  { %v1719_v54 = vadd.f32 %v1711_v61, %v1699_v23  ;;  %v4283_v56 = vpop.f32.mrb[54].mxu1 }
 0x695   :  { %v1714_v59 = vmul.f32 %v4283_v56, %v5881_v29  ;;  %v1446_v30 = vpop.f32.mrb[55].mxu1 }
 0x696   :  { %v1713_v62 = vmul.f32 %v5881_v29, %v1446_v30 }
 0x697   :  { %v1722_v22 = vadd.f32 %v1714_v59, %v1702_v39 }
 0x698   :  { %v1721_v21 = vadd.f32 %v1713_v62, %v1701_v40  ;;  %v4286_v26 = vpop.f32.mrb[56].mxu1 }
 0x699   :  { %v1716_v32 = vmul.f32 %v4286_v26, %v5881_v29  ;;  %v1456_v33 = vpop.f32.mrb[57].mxu1 }
 0x69a   :  { %v1715_v15 = vmul.f32 %v5881_v29, %v1456_v33 }
 0x69b   :  { %v1724_v31 = vadd.f32 %v1716_v32, %v1704_v11 }
 0x69c   :  { %v1723_v16 = vadd.f32 %v1715_v15, %v1703_v17  ;;  %v4289_v20 = vpop.f32.mrb[58].mxu1 }
 0x69d   :  { %v1718_v1 = vmul.f32 %v4289_v20, %v5881_v29  ;;  %v1466_v37 = vpop.f32.mrb[59].mxu1 }
 0x69e   :  { %v1717_v23 = vmul.f32 %v5881_v29, %v1466_v37 }
 0x69f   :  { %v1726_v24 = vadd.f32 %v1718_v1, %v1706_v49  ;;  %v1749_v49 = vsub.s32 6, %v5807_v8 }
 0x6a0   :  { %v1725_v28 = vadd.f32 %v1717_v23, %v1705_v51  ;;  %v4292_v58 = vpop.f32.mrb[60].mxu1 }
 0x6a1   :  { %v1732_v38 = vmul.f32 %v4292_v58, %v5893_v19  ;;  %v1476_v39 = vpop.f32.mrb[61].mxu1 }
 0x6a2   :  { %v1731_v40 = vmul.f32 %v5893_v19, %v1476_v39 }
 0x6a3   :  { %v1740_v57 = vadd.f32 %v1732_v38, %v1720_v18 }
 0x6a4   :  { %v1739_v44 = vadd.f32 %v1731_v40, %v1719_v54  ;;  %v4295_v27 = vpop.f32.mrb[62].mxu1  ;;  %v5905_v54 = vrot.slane %v5820_v48, %v1749_v49 }
 0x6a5   :  { %v1734_v41 = vmul.f32 %v4295_v27, %v5893_v19  ;;  %v1486_v45 = vpop.f32.mrb[63].mxu1 }
 0x6a6   :  { %v1733_v11 = vmul.f32 %v5893_v19, %v1486_v45 }
 0x6a7   :  { %v1742_v17 = vadd.f32 %v1734_v41, %v1722_v22 }
 0x6a8   :  { %v1741_v25 = vadd.f32 %v1733_v11, %v1721_v21  ;;  %v4298_v46 = vpop.f32.mrb[64].mxu1 }
 0x6a9   :  { %v1736_v50 = vmul.f32 %v4298_v46, %v5893_v19  ;;  %v1496_v13 = vpop.f32.mrb[65].mxu1 }
 0x6aa   :  { %v1735_v51 = vmul.f32 %v5893_v19, %v1496_v13 }
 0x6ab   :  { %v1744_v60 = vadd.f32 %v1736_v50, %v1724_v31 }
 0x6ac   :  { %v1743_v47 = vadd.f32 %v1735_v51, %v1723_v16  ;;  %v4301_v55 = vpop.f32.mrb[66].mxu1 }
 0x6ad   :  { %v1738_v61 = vmul.f32 %v4301_v55, %v5893_v19  ;;  %v1506_v18 = vpop.f32.mrb[67].mxu1 }
 0x6ae   :  { %v1737_v56 = vmul.f32 %v5893_v19, %v1506_v18 }
 0x6af   :  { %v1746_v59 = vadd.f32 %v1738_v61, %v1726_v24 }
 0x6b0   :  { %v1745_v30 = vadd.f32 %v1737_v56, %v1725_v28  ;;  %v4304_v62 = vpop.f32.mrb[68].mxu1  ;;  %v1769_v28 = vsub.s32 7, %v5807_v8 }
 0x6b1   :  { %v1752_v22 = vmul.f32 %v4304_v62, %v5905_v54  ;;  %v1516_v21 = vpop.f32.mrb[69].mxu1 }
 0x6b2   :  { %v1751_v26 = vmul.f32 %v5905_v54, %v1516_v21  ;;  %v5917_v27 = vrot.slane %v5820_v48, %v1769_v28 }
 0x6b3   :  { %v1760_v32 = vadd.f32 %v1752_v22, %v1740_v57 }
 0x6b4   :  { %v1759_v33 = vadd.f32 %v1751_v26, %v1739_v44  ;;  %v4307_v35 = vpop.f32.mrb[70].mxu1 }
 0x6b5   :  { %v1754_v15 = vmul.f32 %v4307_v35, %v5905_v54  ;;  %v1526_v31 = vpop.f32.mrb[71].mxu1 }
 0x6b6   :  { %v1753_v16 = vmul.f32 %v5905_v54, %v1526_v31 }
 0x6b7   :  { %v1762_v20 = vadd.f32 %v1754_v15, %v1742_v17 }
 0x6b8   :  { %v1761_v1 = vadd.f32 %v1753_v16, %v1741_v25  ;;  %v4310_v37 = vpop.f32.mrb[72].mxu1 }
 0x6b9   :  { %v1756_v23 = vmul.f32 %v4310_v37, %v5905_v54  ;;  %v1536_v24 = vpop.f32.mrb[73].mxu1 }
 0x6ba   :  { %v1755_v58 = vmul.f32 %v5905_v54, %v1536_v24 }
 0x6bb   :  { %v1764_v38 = vadd.f32 %v1756_v23, %v1744_v60 }
 0x6bc   :  { %v1763_v39 = vadd.f32 %v1755_v58, %v1743_v47  ;;  %v4313_v40 = vpop.f32.mrb[74].mxu1 }
 0x6bd   :  { %v1758_v57 = vmul.f32 %v4313_v40, %v5905_v54  ;;  %v1546_v44 = vpop.f32.mrb[75].mxu1 }
 0x6be   :  { %v1757_v41 = vmul.f32 %v5905_v54, %v1546_v44 }
 0x6bf   :  { %v1766_v45 = vadd.f32 %v1758_v57, %v1746_v59 }
 0x6c0   :  { %v1765_v11 = vadd.f32 %v1757_v41, %v1745_v30  ;;  %v4316_v17 = vpop.f32.mrb[76].mxu1 }
 0x6c1   :  { %v1772_v25 = vmul.f32 %v4316_v17, %v5917_v27  ;;  %v1556_v46 = vpop.f32.mrb[77].mxu1 }
 0x6c2   :  { %v1771_v8 = vmul.f32 %v5917_v27, %v1556_v46 }
 0x6c3   :  { %v1780_v50 = vadd.f32 %v1772_v25, %v1760_v32 }
 0x6c4   :  { %v1779_v13 = vadd.f32 %v1771_v8, %v1759_v33  ;;  %v4319_v49 = vpop.f32.mrb[78].mxu1  ;;  %v3634_v33 = vld [vmem:[%s6610_s8 + $0x8] ss:$0 sm:$0xff] }
 0x6c5   :  { %v1774_v51 = vmul.f32 %v4319_v49, %v5917_v27  ;;  %v1566_v60 = vpop.f32.mrb[79].mxu1 }
 0x6c6   :  { %v1773_v47 = vmul.f32 %v5917_v27, %v1566_v60 }
 0x6c7   :  { %v1782_v48 = vadd.f32 %v1774_v51, %v1762_v20 }
 0x6c8   :  { %v1781_v55 = vadd.f32 %v1773_v47, %v1761_v1  ;;  %v4322_v61 = vpop.f32.mrb[80].mxu1 }
 0x6c9   :  { %v1776_v18 = vmul.f32 %v4322_v61, %v5917_v27  ;;  %v1576_v56 = vpop.f32.mrb[81].mxu1 }
 0x6ca   :  { %v1775_v59 = vmul.f32 %v5917_v27, %v1576_v56 }
 0x6cb   :  { %v1784_v30 = vadd.f32 %v1776_v18, %v1764_v38 }
 0x6cc   :  { %v1783_v62 = vadd.f32 %v1775_v59, %v1763_v39  ;;  %v4325_v22 = vpop.f32.mrb[82].mxu1 }
 0x6cd   :  { %v1778_v21 = vmul.f32 %v4325_v22, %v5917_v27  ;;  %v1586_v26 = vpop.f32.mrb[83].mxu1 }
 0x6ce   :  { %v1777_v32 = vmul.f32 %v5917_v27, %v1586_v26 }
 0x6cf   :  { %v1786_v35 = vadd.f32 %v1778_v21, %v1766_v45 }
 0x6d0   :  { %v1785_v15 = vadd.f32 %v1777_v32, %v1765_v11  ;;  %v4328_v31 = vpop.f32.mrb[84].mxu1 }
 0x6d1   :  { %v1792_v16 = vmul.f32 %v4328_v31, %v3634_v33  ;;  %v1596_v20 = vpop.f32.mrb[85].mxu1 }
 0x6d2   :  { %v1791_v1 = vmul.f32 %v3634_v33, %v1596_v20  ;;  %v5956_v20 = vld [vmem:[%s6605_s3] sm:$0xff] }
 0x6d3   :  { %v1800_v37 = vadd.f32 %v1792_v16, %v1780_v50 }
 0x6d4   :  { %v1799_v23 = vadd.f32 %v1791_v1, %v1779_v13  ;;  %v4331_v24 = vpop.f32.mrb[86].mxu1 }
 0x6d5   :  { %v1794_v28 = vmul.f32 %v4331_v24, %v3634_v33  ;;  %v1606_v58 = vpop.f32.mrb[87].mxu1  ;;  %v4970_v24 = vld [vmem:[%s6606_s4 + $0x8] sm:$0xff] }
 0x6d6   :  { %v1793_v38 = vmul.f32 %v3634_v33, %v1606_v58 }
 0x6d7   :  { %v1802_v39 = vadd.f32 %v1794_v28, %v1782_v48 }
 0x6d8   :  { %v4334_v40 = vpop.f32.mrb[88].mxu1  ;;  %v1801_v57 = vadd.f32 %v1793_v38, %v1781_v55  ;;  %v4971_v38 = vld [vmem:[%s6606_s4] sm:$0xff] }
 0x6d9   :  { %v1796_v44 = vmul.f32 %v4334_v40, %v3634_v33  ;;  %v1616_v41 = vpop.f32.mrb[89].mxu1 }
 0x6da   :  { %v1795_v17 = vmul.f32 %v3634_v33, %v1616_v41 }
 0x6db   :  { %v1804_v25 = vadd.f32 %v1796_v44, %v1784_v30 }
 0x6dc   :  { %v4337_v46 = vpop.f32.mrb[90].mxu1  ;;  %v1803_v45 = vadd.f32 %v1795_v17, %v1783_v62 }
 0x6dd   :  { %v1798_v11 = vmul.f32 %v4337_v46, %v3634_v33  ;;  %v1626_v8 = vpop.f32.mrb[91].mxu1 }
 0x6de   :  { %v1797_v49 = vmul.f32 %v3634_v33, %v1626_v8 }
 0x6df   :  { %v1806_v51 = vadd.f32 %v1798_v11, %v1786_v35 }
 0x6e0   :  { %v1805_v60 = vadd.f32 %v1797_v49, %v1785_v15  ;;  %v5950_v15 = vld [vmem:[%s6605_s3 + $0x8] sm:$0xff] }
 0x71f   :  { %v4344_v50 = vpop.f32.mrb[18].mxu0 }
 0x720   :  { %v5931_v13 = vadd.f32 %v4344_v50, %v1800_v37  ;;  %v1897_v47 = vpop.f32.mrb[19].mxu0 }
 0x721   :  { %v5933_v61 = vadd.f32 %v1897_v47, %v1799_v23 }
 0x727   :  { %v4347_v48 = vpop.f32.mrb[20].mxu0 }
 0x728   :  { %v5935_v18 = vadd.f32 %v4347_v48, %v1802_v39  ;;  %v1907_v55 = vpop.f32.mrb[21].mxu0 }
 0x729   :  { %v5937_v56 = vadd.f32 %v1907_v55, %v1801_v57 }
 0x72b   :  { %v4350_v59 = vpop.f32.mrb[22].mxu0 }
 0x72c   :  { %v5939_v30 = vadd.f32 %v4350_v59, %v1804_v25  ;;  %v1917_v62 = vpop.f32.mrb[23].mxu0 }
 0x72d   :  { %v5941_v22 = vadd.f32 %v1917_v62, %v1803_v45 }
 0x72f   :  { %v4353_v21 = vpop.f32.mrb[24].mxu0 }
 0x730   :  { %v5943_v26 = vadd.f32 %v4353_v21, %v1806_v51  ;;  %v1927_v32 = vpop.f32.mrb[25].mxu0 }
 0x731   :  { %v5945_v33 = vadd.f32 %v1927_v32, %v1805_v60 }
 0x733   :  { %v4372_v35 = vpop.f32.mrb[26].mxu0 }
 0x734   :  { %v2012_v31 = vmul.f32 %v5950_v15, %v4372_v35  ;;  %v2002_v16 = vpop.f32.mrb[27].mxu0 }
 0x735   :  { %v2011_v1 = vmul.f32 %v5956_v20, %v2002_v16 }
 0x737   :  { %v5959_v37 = vpack.c.bf16 %v2012_v31, %v2011_v1  ;;  %4389 = vmatprep.mubr.msk.f32.mxu1 %vm61_vm0, %v2011_v1 }
 0x738   :  { %4390 = vmatmul.mubr.msk.f32.vlgmr.msra.gmra.mrb[92].mxu1 %vm61_vm0, %v2012_v31 }
 0x80b   :  { %v4391_v23 = vpop.f32.mrb[92].mxu1 }
 0x80c   :  { %v2131_v28 = vadd.f32 %v4970_v24, %v4391_v23  ;;  %v2125_v58 = vpop.f32.mrb[93].mxu1 }
 0x80d   :  { %v2126_v39 = vadd.f32 %v4971_v38, %v2125_v58 }
 0x80e   :  { %v2137_v40 = vsel %vm345_vm1, %v2131_v28, -inf }
 0x80f   :  { %2138 = vmax.xlane.f32.xlu1 %v2137_v40  ;;  %v2134_v57 = vsel %vm345_vm1, %v2126_v39, -inf }
 0x810   :  { %2135 = vmax.xlane.f32.xlu0 %v2134_v57  ;;  %v4974_v57 = vld [vmem:[%s6608_s5 + $0x10] sm:$0xff] }
 0x820   :  { %4868 = vrot.lane.b32.xlu1 %v5315_v9, %s5054_s17 }
 0x824   :  { %4878 = vrot.lane.b32.xlu1 %v5327_v12, %s5054_s17 }
 0x828   :  { %4883 = vrot.lane.b32.xlu1 %v5335_v14, %s5054_s17 }
 0x89c   :  { %v2139_v44 = vpop.xlane.xlu1 %2138 }
 0x89d   :  { %v2141_v41 = vsub.f32 %v2131_v28, %v2139_v44  ;;  %v2136_v17 = vpop.xlane.xlu0 %2135 }
 0x89e   :  { %v2140_v25 = vsub.f32 %v2126_v39, %v2136_v17 }
 0x89f   :  { %v2144_v46 = vmul.f32 1.442695, %v2141_v41  ;;  %v4975_v41 = vld [vmem:[%s6608_s5 + $0x18] sm:$0xff] }
 0x8a0   :  { %v2142_v45 = vmul.f32 1.442695, %v2140_v25  ;;  %v4869_v11 = vpop.permute.xlu1 %4868 }
 0x8a1   :  { %4927 = vpow2.f32 %v2144_v46  ;;  %v4871_v8 = vunpack.i.h.bf16 %v4869_v11  ;;  %v4870_v49 = vunpack.i.l.bf16 %v4869_v11  ;;  %v4976_v11 = vld [vmem:[%s6608_s5 + $0x20] sm:$0xff] }
 0x8a2   :  { %4929 = vpow2.f32 %v2142_v45 }
 0x8a3   :  { %v5977_v51 = vpack.c.bf16 %v4871_v8, %v4870_v49  ;;  %v4977_v49 = vld [vmem:[%s6608_s5 + $0x28] sm:$0xff] }
 0x8a4   :  { %v4879_v47 = vpop.permute.xlu1 %4878 }
 0x8a5   :  { %4750 = vmatprep.subr.bf16.mxu0 %v5977_v51  ;;  %v4881_v59 = vunpack.i.h.bf16 %v4879_v47  ;;  %v4880_v62 = vunpack.i.l.bf16 %v4879_v47  ;;  %v4978_v47 = vld [vmem:[%s6608_s5 + $0x30] sm:$0xff] }
 0x8a6   :  { %4752 = vmatpush3.bf16.msra.mxu0 %v5977_v51 }
 0x8a7   :  { %v5987_v16 = vpack.c.bf16 %v4881_v59, %v4880_v62 }
 0x8a8   :  { %v4884_v35 = vpop.permute.xlu1 %4883 }
 0x8a9   :  { %v4886_v1 = vunpack.i.h.bf16 %v4884_v35  ;;  %v4885_v23 = vunpack.i.l.bf16 %v4884_v35 }
 0x8ab   :  { %v4928_v9 = vpop.eup %4927  ;;  %v5992_v28 = vpack.c.bf16 %v4886_v1, %v4885_v23 }
 0x8ac   :  { %v2149_v12 = vsel %vm345_vm1, %v4928_v9, 0.0  ;;  %v4930_v14 = vpop.eup %4929 }
 0x8ad   :  { %2150 = vadd.xlane.f32.xlu0 %v2149_v12  ;;  %v2146_v60 = vsel %vm345_vm1, %v4930_v14, 0.0 }
 0x8b1   :  { %2147 = vadd.xlane.f32.xlu0 %v2146_v60 }
 0x8c7   :  { %4873 = vrot.lane.b32.xlu0 %v5319_v10, %s5054_s17 }
 0x93a   :  { %v2151_v50 = vpop.xlane.xlu0 %2150 }
 0x93e   :  { %v2148_v48 = vpop.xlane.xlu0 %2147 }
 0x93f   :  { %4931 = vrcp.f32 %v2148_v48 }
 0x940   :  { %4933 = vrcp.f32 %v2151_v50 }
 0x942   :  { %v4874_v55 = vpop.permute.xlu0 %4873 }
 0x943   :  { %v4876_v21 = vunpack.i.h.bf16 %v4874_v55  ;;  %v4875_v32 = vunpack.i.l.bf16 %v4874_v55  ;;  %v4979_v55 = vld [vmem:[%s6608_s5 + $0x38] sm:$0xff] }
 0x945   :  { %v5985_v31 = vpack.c.bf16 %v4876_v21, %v4875_v32 }
 0x947   :  { %4754 = vmatprep.subr.bf16.mxu0 %v5985_v31 }
 0x948   :  { %4756 = vmatpush3.bf16.msra.mxu0 %v5985_v31 }
 0x949   :  { %v4932_v10 = vpop.eup %4931  ;;  %4758 = vmatprep.subr.bf16.mxu0 %v5987_v16 }
 0x94a   :  { %v2153_v24 = vmul.f32 %v4932_v10, %v4930_v14  ;;  %v4934_v58 = vpop.eup %4933 }
 0x94b   :  { %v2155_v38 = vmul.f32 %v4934_v58, %v4928_v9 }
 0x94c   :  { %4760 = vmatpush3.bf16.msra.mxu0 %v5987_v16  ;;  %4408 = vmatprep.mubr.msk.f32.mxu0 %vm345_vm1, %v2153_v24 }
 0x94d   :  { %4762 = vmatprep.subr.bf16.mxu0 %v5992_v28 }
 0x950   :  { %4764 = vmatpush3.bf16.msra.mxu0 %v5992_v28 }
 0x951   :  { %4767 = vmatprep.subr.msk.bf16.mxu0 %vm5257_vm2, %v5959_v37 }
 0x953   :  { %4409 = vmatmul.mubr.msk.f32.vlgmr.msra.gmra.mrb[28].mxu0 %vm345_vm1, %v2155_v38 }
 0x954   :  { %4415 = vmatprep.mubr.msk.f32.mxu0 %vm61_vm0, %v5291_v0 }
 0x959   :  { %4770 = vmatpush3.bf16.xpose.msk.msra.mxu0 %vm5257_vm2, %v5959_v37 }
 0x95a   :  { %4772 = vmatprep.subr.bf16.mxu0 %v5388_v36 }
 0x960   :  { %4416 = vmatmul.mubr.msk.f32.vlgmr.msra.gmra.mrb[30].mxu0 %vm61_vm0, %v5289_v63 }
 0x961   :  { %4418 = vmatprep.mubr.msk.f32.mxu0 %vm61_vm0, %v5299_v3  ;;  %4774 = vmatpush3.bf16.msra.mxu0 %v5388_v36 }
 0x962   :  { %4776 = vmatprep.subr.bf16.mxu0 %v5977_v51 }
 0x964   :  { %4419 = vmatmul.mubr.msk.f32.gmra.mrb[32].mxu0 %vm61_vm0, %v5297_v2 }
 0x965   :  { %4421 = vmatprep.mubr.msk.f32.mxu0 %vm61_vm0, %v5303_v5 }
 0x968   :  { %4422 = vmatmul.mubr.msk.f32.gmra.mrb[34].mxu0 %vm61_vm0, %v5301_v4  ;;  %v4972_v4 = vld [vmem:[%s6608_s5 + $0x8] sm:$0xff] }
 0x969   :  { %4424 = vmatprep.mubr.msk.f32.mxu0 %vm61_vm0, %v5307_v7 }
 0x96c   :  { %4425 = vmatmul.mubr.msk.f32.gmra.mrb[36].mxu0 %vm61_vm0, %v5305_v6  ;;  %v4973_v6 = vld [vmem:[%s6608_s5] sm:$0xff] }
 0xa26   :  { %v4410_v43 = vpop.f32.mrb[28].mxu0 }
 0xa27   :  { %v2262_v63 = vmul.f32 %v5950_v15, %v4410_v43  ;;  %v2252_v0 = vpop.f32.mrb[29].mxu0 }
 0xa28   :  { %v2261_v3 = vmul.f32 %v5956_v20, %v2252_v0 }
 0xa2a   :  { %v6026_v36 = vpack.c.bf16 %v2262_v63, %v2261_v3 }
 0xa2c   :  { %4803 = vmatprep.subr.bf16.mxu1 %v6026_v36 }
 0xa2d   :  { %4804 = vmatpush3.bf16.msra.mxu1 %v6026_v36 }
 0xa33   :  { %v4417_v2 = vpop.f32.mrb[30].mxu0 }
 0xa34   :  { %v2351_v5 = vadd.f32 %v4972_v4, %v4417_v2  ;;  %v2345_v7 = vpop.f32.mrb[31].mxu0 }
 0xa35   :  { %v2346_v15 = vadd.f32 %v4973_v6, %v2345_v7 }
 0xa36   :  { %v2387_v20 = vsel %vm800_vm3, %v2351_v5, -inf }
 0xa37   :  { %2388 = vmax.xlane.f32.xlu1 %v2387_v20  ;;  %v4420_v37 = vpop.f32.mrb[32].mxu0  ;;  %v2384_v39 = vsel %vm800_vm3, %v2346_v15, -inf }
 0xa38   :  { %v2355_v40 = vpop.f32.mrb[33].mxu0  ;;  %2385 = vmax.xlane.f32.xlu0 %v2384_v39  ;;  %v2361_v17 = vadd.f32 %v4975_v41, %v4420_v37 }
 0xa39   :  { %v2356_v44 = vadd.f32 %v4974_v57, %v2355_v40 }
 0xa3a   :  { %v2393_v60 = vsel %vm800_vm3, %v2361_v17, -inf }
 0xa3b   :  { %v4423_v25 = vpop.f32.mrb[34].mxu0  ;;  %v2390_v46 = vsel %vm800_vm3, %v2356_v44, -inf }
 0xa3c   :  { %v2365_v45 = vpop.f32.mrb[35].mxu0  ;;  %2391 = vmax.xlane.f32.xlu0 %v2390_v46  ;;  %v2371_v9 = vadd.f32 %v4977_v49, %v4423_v25  ;;  %v4981_v49 = vld [vmem:[%s6609_s7 + $0x8] sm:$0xff] }
 0xa3d   :  { %v2366_v8 = vadd.f32 %v4976_v11, %v2365_v45 }
 0xa3e   :  { %v2399_v21 = vsel %vm800_vm3, %v2371_v9, -inf }
 0xa3f   :  { %v4426_v12 = vpop.f32.mrb[36].mxu0  ;;  %v2396_v14 = vsel %vm800_vm3, %v2366_v8, -inf }
 0xa40   :  { %v2375_v50 = vpop.f32.mrb[37].mxu0  ;;  %2397 = vmax.xlane.f32.xlu1 %v2396_v14  ;;  %2394 = vmax.xlane.f32.xlu0 %v2393_v60  ;;  %v2381_v59 = vadd.f32 %v4979_v55, %v4426_v12  ;;  %v4984_v12 = vld [vmem:[%s6609_s7 + $0x20] sm:$0xff]  ;;  %v4986_v14 = vld [vmem:[%s6609_s7 + $0x30] sm:$0xff]  ;;  %v4987_v60 = vld [vmem:[%s6609_s7 + $0x38] sm:$0xff] }
 0xa41   :  { %v2376_v48 = vadd.f32 %v4978_v47, %v2375_v50  ;;  %v4988_v50 = vld [vmem:[%s6609_s7 + $0x40] sm:$0xff]  ;;  %v4989_v47 = vld [vmem:[%s6609_s7 + $0x48] sm:$0xff]  ;;  %v4991_v55 = vld [vmem:[%s6609_s7 + $0x58] sm:$0xff] }
 0xa42   :  { %v2405_v32 = vsel %vm800_vm3, %v2381_v59, -inf }
 0xa43   :  { %v2402_v62 = vsel %vm800_vm3, %v2376_v48, -inf }
 0xa44   :  { %2403 = vmax.xlane.f32.xlu1 %v2402_v62  ;;  %2400 = vmax.xlane.f32.xlu0 %v2399_v21  ;;  %v4993_v62 = vld [vmem:[%s6609_s7 + $0x68] sm:$0xff]  ;;  %v4994_v21 = vld [vmem:[%s6609_s7 + $0x70] sm:$0xff] }
 0xa48   :  { %2406 = vmax.xlane.f32.xlu0 %v2405_v32  ;;  %v4995_v32 = vld [vmem:[%s6609_s7 + $0x78] sm:$0xff] }
 0xac4   :  { %v2389_v35 = vpop.xlane.xlu1 %2388 }
 0xac5   :  { %v2409_v1 = vsub.f32 %v2351_v5, %v2389_v35  ;;  %v2386_v23 = vpop.xlane.xlu0 %2385  ;;  %v4996_v35 = vld [vmem:[%s6609_s7 + $0x80] sm:$0xff] }
 0xac6   :  { %v2408_v10 = vsub.f32 %v2346_v15, %v2386_v23  ;;  %v4998_v23 = vld [vmem:[%s6609_s7 + $0x90] sm:$0xff] }
 0xac7   :  { %v2418_v24 = vmul.f32 1.442695, %v2409_v1  ;;  %v4997_v1 = vld [vmem:[%s6609_s7 + $0x88] sm:$0xff] }
 0xac8   :  { %v2416_v58 = vmul.f32 1.442695, %v2408_v10  ;;  %v4999_v10 = vld [vmem:[%s6609_s7 + $0x98] sm:$0xff] }
 0xac9   :  { %v2392_v38 = vpop.xlane.xlu0 %2391 }
 0xaca   :  { %4935 = vpow2.f32 %v2416_v58  ;;  %v2410_v43 = vsub.f32 %v2356_v44, %v2392_v38  ;;  %v5001_v58 = vld [vmem:[%s6609_s7 + $0xa8] sm:$0xff]  ;;  %v5002_v38 = vld [vmem:[%s6609_s7 + $0xb0] sm:$0xff] }
 0xacb   :  { %4937 = vpow2.f32 %v2418_v24  ;;  %v5000_v24 = vld [vmem:[%s6609_s7 + $0xa0] sm:$0xff] }
 0xacc   :  { %v2420_v63 = vmul.f32 1.442695, %v2410_v43  ;;  %v5003_v43 = vld [vmem:[%s6609_s7 + $0xb8] sm:$0xff] }
 0xacd   :  { %v2398_v0 = vpop.xlane.xlu1 %2397  ;;  %v2395_v3 = vpop.xlane.xlu0 %2394 }
 0xace   :  { %4939 = vpow2.f32 %v2420_v63  ;;  %v2412_v2 = vsub.f32 %v2366_v8, %v2398_v0  ;;  %v2411_v4 = vsub.f32 %v2361_v17, %v2395_v3  ;;  %v5004_v63 = vld [vmem:[%s6609_s7 + $0xc0] sm:$0xff]  ;;  %v5005_v0 = vld [vmem:[%s6609_s7 + $0xc8] sm:$0xff]  ;;  %v5006_v3 = vld [vmem:[%s6609_s7 + $0xd0] sm:$0xff] }
 0xad0   :  { %v2424_v7 = vmul.f32 1.442695, %v2412_v2  ;;  %v2422_v6 = vmul.f32 1.442695, %v2411_v4  ;;  %v5007_v2 = vld [vmem:[%s6609_s7 + $0xd8] sm:$0xff]  ;;  %v5008_v4 = vld [vmem:[%s6609_s7 + $0xe0] sm:$0xff] }
 0xad1   :  { %v2404_v20 = vpop.xlane.xlu1 %2403  ;;  %v2401_v37 = vpop.xlane.xlu0 %2400 }
 0xad2   :  { %4941 = vpow2.f32 %v2424_v7  ;;  %v2414_v5 = vsub.f32 %v2376_v48, %v2404_v20  ;;  %v2413_v39 = vsub.f32 %v2371_v9, %v2401_v37  ;;  %v4983_v9 = vld [vmem:[%s6609_s7 + $0x18] sm:$0xff]  ;;  %v4990_v48 = vld [vmem:[%s6609_s7 + $0x50] sm:$0xff]  ;;  %v5009_v7 = vld [vmem:[%s6609_s7 + $0xe8] sm:$0xff] }
 0xad3   :  { %4943 = vpow2.f32 %v2422_v6  ;;  %v5010_v6 = vld [vmem:[%s6609_s7 + $0xf0] sm:$0xff]  ;;  %v5011_v20 = vld [vmem:[%s6609_s7 + $0xf8] sm:$0xff]  ;;  %v5012_v37 = vld [vmem:[%s6609_s7 + $0x100] sm:$0xff] }
 0xad4   :  { %v6062_v15 = vpop.eup %4935  ;;  %v2428_v40 = vmul.f32 1.442695, %v2414_v5  ;;  %v2426_v57 = vmul.f32 1.442695, %v2413_v39  ;;  %v5013_v5 = vld [vmem:[%s6609_s7 + $0x108] sm:$0xff]  ;;  %v5014_v39 = vld [vmem:[%s6609_s7 + $0x110] sm:$0xff] }
 0xad5   :  { %v6064_v44 = vpop.eup %4937  ;;  %4431 = vmatprep.mubr.msk.f32.mxu0 %vm800_vm3, %v6062_v15  ;;  %v2407_v41 = vpop.xlane.xlu0 %2406 }
 0xad6   :  { %4945 = vpow2.f32 %v2428_v40  ;;  %v2415_v17 = vsub.f32 %v2381_v59, %v2407_v41  ;;  %4432 = vmatmul.mubr.msk.f32.vlgmr.msra.gmra.mrb[38].mxu0 %vm800_vm3, %v6064_v44  ;;  %v4992_v59 = vld [vmem:[%s6609_s7 + $0x60] sm:$0xff]  ;;  %v5015_v40 = vld [vmem:[%s6609_s7 + $0x118] sm:$0xff]  ;;  %v5017_v41 = vld [vmem:[%s6609_s7 + $0x128] sm:$0xff] }
 0xad7   :  { %4947 = vpow2.f32 %v2426_v57  ;;  %4778 = vmatpush3.bf16.msra.mxu0 %v5977_v51  ;;  %v5016_v57 = vld [vmem:[%s6609_s7 + $0x120] sm:$0xff] }
 0xad8   :  { %v6071_v25 = vpop.eup %4939  ;;  %v2430_v46 = vmul.f32 1.442695, %v2415_v17  ;;  %4780 = vmatprep.subr.bf16.mxu0 %v5985_v31  ;;  %v5018_v17 = vld [vmem:[%s6609_s7 + $0x130] sm:$0xff] }
 0xad9   :  { %4434 = vmatprep.mubr.msk.f32.mxu0 %vm800_vm3, %v6071_v25 }
 0xada   :  { %4949 = vpow2.f32 %v2430_v46  ;;  %v5019_v46 = vld [vmem:[%s6609_s7 + $0x138] sm:$0xff] }
 0xadb   :  { %4782 = vmatpush3.bf16.msra.mxu0 %v5985_v31 }
 0xadc   :  { %v6077_v45 = vpop.eup %4941  ;;  %4784 = vmatprep.subr.bf16.mxu0 %v5987_v16 }
 0xadd   :  { %v6080_v11 = vpop.eup %4943 }
 0xade   :  { %4435 = vmatmul.mubr.msk.f32.gmra.mrb[40].mxu0 %vm800_vm3, %v6080_v11 }
 0xadf   :  { %4437 = vmatprep.mubr.msk.f32.mxu0 %vm800_vm3, %v6077_v45  ;;  %4786 = vmatpush3.bf16.msra.mxu0 %v5987_v16  ;;  %v4980_v16 = vld [vmem:[%s6609_s7] sm:$0xff] }
 0xae0   :  { %v6087_v51 = vpop.eup %4945  ;;  %4788 = vmatprep.subr.bf16.mxu0 %v5992_v28 }
 0xae1   :  { %v6090_v8 = vpop.eup %4947 }
 0xae2   :  { %4438 = vmatmul.mubr.msk.f32.gmra.mrb[42].mxu0 %vm800_vm3, %v6090_v8 }
 0xae3   :  { %4440 = vmatprep.mubr.msk.f32.mxu0 %vm800_vm3, %v6087_v51  ;;  %4790 = vmatpush3.bf16.msra.mxu0 %v5992_v28  ;;  %v4982_v28 = vld [vmem:[%s6609_s7 + $0x10] sm:$0xff] }
 0xae4   :  { %v6097_v31 = vpop.eup %4949  ;;  %4792 = vmatprep.subr.bf16.mxu0 %v6026_v36 }
 0xae6   :  { %4441 = vmatmul.mubr.msk.f32.gmra.mrb[44].mxu0 %vm800_vm3, %v6097_v31 }
 0xae7   :  { %4459 = vmatprep.mubr.msk.f32.mxu0 %vm345_vm1, %v4980_v16  ;;  %v5020_v16 = vld [vmem:[%s6609_s7 + $0x140] sm:$0xff] }
 0xaea   :  { %4460 = vmatmul.mubr.msk.f32.vlgmr.msra.gmra.mrb[46].mxu0 %vm345_vm1, %v4981_v49  ;;  %v5021_v49 = vld [vmem:[%s6609_s7 + $0x148] sm:$0xff] }
 0xaeb   :  { %4794 = vmatpush3.bf16.msra.mxu0 %v6026_v36  ;;  %4462 = vmatprep.mubr.msk.f32.mxu0 %vm345_vm1, %v4982_v28  ;;  %v4985_v36 = vld [vmem:[%s6609_s7 + $0x28] sm:$0xff]  ;;  %v5022_v28 = vld [vmem:[%s6609_s7 + $0x150] sm:$0xff] }
 0xaee   :  { %4463 = vmatmul.mubr.msk.f32.gmra.mrb[48].mxu0 %vm345_vm1, %v4983_v9  ;;  %v5023_v9 = vld [vmem:[%s6609_s7 + $0x158] sm:$0xff] }
 0xaef   :  { %4465 = vmatprep.mubr.msk.f32.mxu0 %vm345_vm1, %v4984_v12  ;;  %v5024_v12 = vld [vmem:[%s6609_s7 + $0x160] sm:$0xff] }
 0xaf2   :  { %4466 = vmatmul.mubr.msk.f32.gmra.mrb[50].mxu0 %vm345_vm1, %v4985_v36  ;;  %v5025_v36 = vld [vmem:[%s6609_s7 + $0x168] sm:$0xff] }
 0xaf3   :  { %4468 = vmatprep.mubr.msk.f32.mxu0 %vm345_vm1, %v4986_v14  ;;  %v5026_v14 = vld [vmem:[%s6609_s7 + $0x170] sm:$0xff] }
 0xaf6   :  { %4469 = vmatmul.mubr.msk.f32.gmra.mrb[52].mxu0 %vm345_vm1, %v4987_v60  ;;  %v3290_v60 = vld [vmem:[%s6611_s10] sm:$0xff] }
 0xaf7   :  { %4471 = vmatprep.mubr.msk.f32.mxu0 %vm345_vm1, %v4988_v50  ;;  %v3291_v50 = vld [vmem:[%s6611_s10 + $0x8] sm:$0xff] }
 0xafa   :  { %4472 = vmatmul.mubr.msk.f32.gmra.mrb[54].mxu0 %vm345_vm1, %v4989_v47  ;;  %v6297_v47 = vpack.c.bf16 %v3291_v50, %v3290_v60  ;;  %v3292_v50 = vld [vmem:[%s6611_s10 + $0x10] sm:$0xff] }
 0xafb   :  { %4474 = vmatprep.mubr.msk.f32.mxu0 %vm345_vm1, %v4990_v48  ;;  %v5027_v48 = vld [vmem:[%s6609_s7 + $0x178] sm:$0xff] }
 0xafc   :  { %4796 = vmatprep.subr.bf16.mxu1 %v6297_v47 }
 0xafe   :  { %4475 = vmatmul.mubr.msk.f32.gmra.mrb[56].mxu0 %vm345_vm1, %v4991_v55  ;;  %v5028_v55 = vld [vmem:[%s6609_s7 + $0x180] sm:$0xff] }
 0xaff   :  { %4477 = vmatprep.mubr.msk.f32.mxu0 %vm345_vm1, %v4992_v59  ;;  %v5029_v59 = vld [vmem:[%s6609_s7 + $0x188] sm:$0xff] }
 0xb02   :  { %4478 = vmatmul.mubr.msk.f32.gmra.mrb[58].mxu0 %vm345_vm1, %v4993_v62  ;;  %v5030_v62 = vld [vmem:[%s6609_s7 + $0x190] sm:$0xff] }
 0xb03   :  { %4480 = vmatprep.mubr.msk.f32.mxu0 %vm345_vm1, %v4994_v21  ;;  %v5031_v21 = vld [vmem:[%s6609_s7 + $0x198] sm:$0xff] }
 0xb06   :  { %4481 = vmatmul.mubr.msk.f32.gmra.mrb[60].mxu0 %vm345_vm1, %v4995_v32  ;;  %v5032_v32 = vld [vmem:[%s6609_s7 + $0x1a0] sm:$0xff] }
 0xb07   :  { %4483 = vmatprep.mubr.msk.f32.mxu0 %vm345_vm1, %v4996_v35  ;;  %v5033_v35 = vld [vmem:[%s6609_s7 + $0x1a8] sm:$0xff] }
 0xb0a   :  { %4484 = vmatmul.mubr.msk.f32.gmra.mrb[62].mxu0 %vm345_vm1, %v4997_v1  ;;  %v5034_v1 = vld [vmem:[%s6609_s7 + $0x1b0] sm:$0xff] }
 0xb0b   :  { %4486 = vmatprep.mubr.msk.f32.mxu0 %vm345_vm1, %v4998_v23  ;;  %v5035_v23 = vld [vmem:[%s6609_s7 + $0x1b8] sm:$0xff] }
 0xb0e   :  { %4487 = vmatmul.mubr.msk.f32.gmra.mrb[64].mxu0 %vm345_vm1, %v4999_v10  ;;  %v5036_v10 = vld [vmem:[%s6609_s7 + $0x1c0] sm:$0xff] }
 0xb0f   :  { %4489 = vmatprep.mubr.msk.f32.mxu0 %vm345_vm1, %v5000_v24  ;;  %v5037_v24 = vld [vmem:[%s6609_s7 + $0x1c8] sm:$0xff] }
 0xb12   :  { %4490 = vmatmul.mubr.msk.f32.gmra.mrb[66].mxu0 %vm345_vm1, %v5001_v58  ;;  %v5038_v58 = vld [vmem:[%s6609_s7 + $0x1d0] sm:$0xff] }
 0xb13   :  { %4492 = vmatprep.mubr.msk.f32.mxu0 %vm345_vm1, %v5002_v38  ;;  %v5039_v38 = vld [vmem:[%s6609_s7 + $0x1d8] sm:$0xff] }
 0xb16   :  { %4493 = vmatmul.mubr.msk.f32.gmra.mrb[68].mxu0 %vm345_vm1, %v5003_v43  ;;  %v5040_v43 = vld [vmem:[%s6609_s7 + $0x1e0] sm:$0xff] }
 0xb17   :  { %4495 = vmatprep.mubr.msk.f32.mxu0 %vm345_vm1, %v5004_v63  ;;  %v5041_v63 = vld [vmem:[%s6609_s7 + $0x1e8] sm:$0xff] }
 0xb1a   :  { %4496 = vmatmul.mubr.msk.f32.gmra.mrb[70].mxu0 %vm345_vm1, %v5005_v0  ;;  %v5042_v0 = vld [vmem:[%s6609_s7 + $0x1f0] sm:$0xff] }
 0xb1b   :  { %4498 = vmatprep.mubr.msk.f32.mxu0 %vm345_vm1, %v5006_v3  ;;  %v5043_v3 = vld [vmem:[%s6609_s7 + $0x1f8] sm:$0xff] }
 0xb1e   :  { %4499 = vmatmul.mubr.msk.f32.gmra.mrb[72].mxu0 %vm345_vm1, %v5007_v2  ;;  %v5044_v2 = vld [vmem:[%s6609_s7 + $0x200] sm:$0xff] }
 0xb1f   :  { %4501 = vmatprep.mubr.msk.f32.mxu0 %vm345_vm1, %v5008_v4  ;;  %v5045_v4 = vld [vmem:[%s6609_s7 + $0x208] sm:$0xff] }
 0xb22   :  { %4502 = vmatmul.mubr.msk.f32.gmra.mrb[74].mxu0 %vm345_vm1, %v5009_v7  ;;  %v5046_v7 = vld [vmem:[%s6609_s7 + $0x210] sm:$0xff] }
 0xb23   :  { %4504 = vmatprep.mubr.msk.f32.mxu0 %vm345_vm1, %v5010_v6  ;;  %v5047_v6 = vld [vmem:[%s6609_s7 + $0x218] sm:$0xff] }
 0xb26   :  { %4505 = vmatmul.mubr.msk.f32.gmra.mrb[76].mxu0 %vm345_vm1, %v5011_v20  ;;  %v5048_v20 = vld [vmem:[%s6609_s7 + $0x220] sm:$0xff] }
 0xb27   :  { %4507 = vmatprep.mubr.msk.f32.mxu0 %vm345_vm1, %v5012_v37  ;;  %v5049_v37 = vld [vmem:[%s6609_s7 + $0x228] sm:$0xff] }
 0xb2a   :  { %4508 = vmatmul.mubr.msk.f32.gmra.mrb[78].mxu0 %vm345_vm1, %v5013_v5  ;;  %v5050_v5 = vld [vmem:[%s6609_s7 + $0x230] sm:$0xff] }
 0xb2b   :  { %4510 = vmatprep.mubr.msk.f32.mxu0 %vm345_vm1, %v5014_v39  ;;  %v5051_v39 = vld [vmem:[%s6609_s7 + $0x238] sm:$0xff] }
 0xb2e   :  { %4511 = vmatmul.mubr.msk.f32.gmra.mrb[80].mxu0 %vm345_vm1, %v5015_v40 }
 0xb2f   :  { %4513 = vmatprep.mubr.msk.f32.mxu0 %vm345_vm1, %v5016_v57 }
 0xb32   :  { %4514 = vmatmul.mubr.msk.f32.gmra.mrb[82].mxu0 %vm345_vm1, %v5017_v41 }
 0xb33   :  { %4516 = vmatprep.mubr.msk.f32.mxu0 %vm345_vm1, %v5018_v17 }
 0xb36   :  { %4517 = vmatmul.mubr.msk.f32.gmra.mrb[84].mxu0 %vm345_vm1, %v5019_v46 }
 0xb37   :  { %4519 = vmatprep.mubr.msk.f32.mxu0 %vm345_vm1, %v5020_v16 }
 0xb3a   :  { %4520 = vmatmul.mubr.msk.f32.gmra.mrb[86].mxu0 %vm345_vm1, %v5021_v49 }
 0xb3b   :  { %4522 = vmatprep.mubr.msk.f32.mxu0 %vm345_vm1, %v5022_v28 }
 0xb3e   :  { %4523 = vmatmul.mubr.msk.f32.gmra.mrb[88].mxu0 %vm345_vm1, %v5023_v9 }
 0xb3f   :  { %4525 = vmatprep.mubr.msk.f32.mxu0 %vm345_vm1, %v5024_v12 }
 0xb42   :  { %4526 = vmatmul.mubr.msk.f32.gmra.mrb[90].mxu0 %vm345_vm1, %v5025_v36 }
 0xb43   :  { %4528 = vmatprep.mubr.msk.f32.mxu0 %vm345_vm1, %v5026_v14 }
 0xb46   :  { %4529 = vmatmul.mubr.msk.f32.gmra.mrb[92].mxu0 %vm345_vm1, %v5027_v48 }
 0xb47   :  { %4531 = vmatprep.mubr.msk.f32.mxu0 %vm345_vm1, %v5028_v55 }
 0xb4a   :  { %4532 = vmatmul.mubr.msk.f32.gmra.mrb[94].mxu0 %vm345_vm1, %v5029_v59 }
 0xb4b   :  { %4534 = vmatprep.mubr.msk.f32.mxu0 %vm345_vm1, %v5030_v62 }
 0xb4e   :  { %4535 = vmatmul.mubr.msk.f32.gmra.mrb[96].mxu0 %vm345_vm1, %v5031_v21 }
 0xb4f   :  { %4537 = vmatprep.mubr.msk.f32.mxu0 %vm345_vm1, %v5032_v32 }
 0xb52   :  { %4538 = vmatmul.mubr.msk.f32.gmra.mrb[98].mxu0 %vm345_vm1, %v5033_v35 }
 0xb53   :  { %4540 = vmatprep.mubr.msk.f32.mxu0 %vm345_vm1, %v5034_v1 }
 0xb56   :  { %4541 = vmatmul.mubr.msk.f32.gmra.mrb[100].mxu0 %vm345_vm1, %v5035_v23 }
 0xb57   :  { %4543 = vmatprep.mubr.msk.f32.mxu0 %vm345_vm1, %v5036_v10 }
 0xb5a   :  { %4544 = vmatmul.mubr.msk.f32.gmra.mrb[102].mxu0 %vm345_vm1, %v5037_v24 }
 0xb5b   :  { %4546 = vmatprep.mubr.msk.f32.mxu0 %vm345_vm1, %v5038_v58  ;;  %v6421_v58 = vld [vmem:[%s6612_s9] ss:$0 sm:$0xff] }
 0xb5e   :  { %4547 = vmatmul.mubr.msk.f32.gmra.mrb[104].mxu0 %vm345_vm1, %v5039_v38 }
 0xb5f   :  { %4549 = vmatprep.mubr.msk.f32.mxu0 %vm345_vm1, %v5040_v43 }
 0xb62   :  { %4550 = vmatmul.mubr.msk.f32.gmra.mrb[106].mxu0 %vm345_vm1, %v5041_v63 }
 0xb63   :  { %4552 = vmatprep.mubr.msk.f32.mxu0 %vm345_vm1, %v5042_v0 }
 0xb66   :  { %4553 = vmatmul.mubr.msk.f32.gmra.mrb[108].mxu0 %vm345_vm1, %v5043_v3  ;;  %v3275_v3 = vadd.f32 %v6421_v58, %v5931_v13 }
 0xb67   :  { %4555 = vmatprep.mubr.msk.f32.mxu0 %vm345_vm1, %v5044_v2 }
 0xb6a   :  { %4556 = vmatmul.mubr.msk.f32.gmra.mrb[110].mxu0 %vm345_vm1, %v5045_v4 }
 0xb6b   :  { %4558 = vmatprep.mubr.msk.f32.mxu0 %vm345_vm1, %v5046_v7 }
 0xb6e   :  { %4559 = vmatmul.mubr.msk.f32.gmra.mrb[112].mxu0 %vm345_vm1, %v5047_v6  ;;  %v3277_v6 = vadd.f32 %v6421_v58, %v5935_v18  ;;  %v3279_v18 = vadd.f32 %v6421_v58, %v5939_v30  ;;  %v3281_v30 = vadd.f32 %v6421_v58, %v5943_v26 }
 0xb6f   :  { %4561 = vmatprep.mubr.msk.f32.mxu0 %vm345_vm1, %v5048_v20 }
 0xb72   :  { %4562 = vmatmul.mubr.msk.f32.gmra.mrb[114].mxu0 %vm345_vm1, %v5049_v37 }
 0xb73   :  { %4564 = vmatprep.mubr.msk.f32.mxu0 %vm345_vm1, %v5050_v5 }
 0xb76   :  { %4565 = vmatmul.mubr.msk.f32.gmra.mrb[116].mxu0 %vm345_vm1, %v5051_v39 }
 0xba9   :  { %v4433_v40 = vpop.f32.mrb[38].mxu0 }
 0xbaa   :  { %4951 = vrcp.f32 %v4433_v40  ;;  %v2522_v57 = vpop.f32.mrb[39].mxu0 }
 0xbab   :  { %4953 = vrcp.f32 %v2522_v57 }
 0xbb1   :  { %v4436_v41 = vpop.f32.mrb[40].mxu0 }
 0xbb2   :  { %4955 = vrcp.f32 %v4436_v41  ;;  %v2532_v17 = vpop.f32.mrb[41].mxu0 }
 0xbb3   :  { %4957 = vrcp.f32 %v2532_v17 }
 0xbb4   :  { %v4952_v46 = vpop.eup %4951 }
 0xbb5   :  { %v4954_v16 = vpop.eup %4953  ;;  %v4439_v49 = vpop.f32.mrb[42].mxu0  ;;  %v2564_v12 = vmul.f32 %v4952_v46, %v6064_v44 }
 0xbb6   :  { %4959 = vrcp.f32 %v4439_v49  ;;  %v2542_v28 = vpop.f32.mrb[43].mxu0  ;;  %v2562_v9 = vmul.f32 %v4954_v16, %v6062_v15  ;;  %v3293_v15 = vld [vmem:[%s6611_s10 + $0x18] sm:$0xff] }
 0xbb7   :  { %4961 = vrcp.f32 %v2542_v28  ;;  %v4799_v21 = vpack.c.bf16 %v3293_v15, %v3292_v50 }
 0xbb8   :  { %4571 = vmatprep.mubr.msk.f32.mxu0 %vm800_vm3, %v2562_v9 }
 0xbb9   :  { %v4442_v36 = vpop.f32.mrb[44].mxu0  ;;  %4572 = vmatmul.mubr.msk.f32.vlgmr.msra.gmra.mrb[118].mxu0 %vm800_vm3, %v2564_v12 }
 0xbba   :  { %4963 = vrcp.f32 %v4442_v36  ;;  %v2552_v14 = vpop.f32.mrb[45].mxu0 }
 0xbbb   :  { %4965 = vrcp.f32 %v2552_v14 }
 0xbbc   :  { %v4956_v60 = vpop.eup %4955 }
 0xbbd   :  { %v4958_v48 = vpop.eup %4957  ;;  %v4461_v44 = vpop.f32.mrb[46].mxu0  ;;  %v2568_v62 = vmul.f32 %v4956_v60, %v6080_v11 }
 0xbbe   :  { %v2566_v55 = vmul.f32 %v4958_v48, %v6071_v25  ;;  %v2643_v59 = vpop.f32.mrb[47].mxu0  ;;  %v3003_v2 = vmul.f32 %v4461_v44, %v5828_v53 }
 0xbc0   :  { %v4960_v32 = vpop.eup %4959  ;;  %4574 = vmatprep.mubr.msk.f32.mxu1 %vm800_vm3, %v2566_v55 }
 0xbc1   :  { %v4962_v35 = vpop.eup %4961  ;;  %4575 = vmatmul.mubr.msk.f32.vlgmr.msra.gmra.mrb[94].mxu1 %vm800_vm3, %v2568_v62  ;;  %v4464_v1 = vpop.f32.mrb[48].mxu0  ;;  %v2572_v24 = vmul.f32 %v4960_v32, %v6090_v8  ;;  %v3274_v8 = vadd.f32 %v6421_v58, %v5933_v61  ;;  %v3002_v61 = vmul.f32 %v2643_v59, %v5828_v53 }
 0xbc2   :  { %v2570_v23 = vmul.f32 %v4962_v35, %v6077_v45  ;;  %4798 = vmatpush3.bf16.msra.mxu1 %v6297_v47  ;;  %v2653_v10 = vpop.f32.mrb[49].mxu0  ;;  %v3005_v20 = vmul.f32 %v4464_v1, %v5828_v53 }
 0xbc3   :  { %4800 = vmatprep.subr.bf16.mxu1 %v4799_v21  ;;  %v3004_v5 = vmul.f32 %v2653_v10, %v5828_v53 }
 0xbc4   :  { %v4964_v25 = vpop.eup %4963  ;;  %4577 = vmatprep.mubr.msk.f32.mxu1 %vm800_vm3, %v2570_v23 }
 0xbc5   :  { %v4966_v11 = vpop.eup %4965  ;;  %4578 = vmatmul.mubr.msk.f32.gmra.mrb[96].mxu1 %vm800_vm3, %v2572_v24  ;;  %v4467_v38 = vpop.f32.mrb[50].mxu0  ;;  %v2576_v43 = vmul.f32 %v4964_v25, %v6097_v31 }
 0xbc6   :  { %v2574_v45 = vmul.f32 %v4966_v11, %v6087_v51  ;;  %4802 = vmatpush3.bf16.msra.mxu1 %v4799_v21  ;;  %v2663_v47 = vpop.f32.mrb[51].mxu0  ;;  %v3276_v51 = vadd.f32 %v6421_v58, %v5937_v56  ;;  %v3278_v56 = vadd.f32 %v6421_v58, %v5941_v22  ;;  %v3280_v22 = vadd.f32 %v6421_v58, %v5945_v33 }
 0xbc7   :  { %v3007_v46 = vmul.f32 %v4467_v38, %v5828_v53  ;;  %v3006_v49 = vmul.f32 %v2663_v47, %v5828_v53 }
 0xbc8   :  { %4580 = vmatprep.mubr.msk.f32.mxu1 %vm800_vm3, %v2574_v45 }
 0xbc9   :  { %4581 = vmatmul.mubr.msk.f32.gmra.mrb[98].mxu1 %vm800_vm3, %v2576_v43  ;;  %v4470_v63 = vpop.f32.mrb[52].mxu0 }
 0xbca   :  { %4591 = vmatprep.mubr.msk.f32.mxu1 %vm61_vm0, %v3274_v8  ;;  %v2673_v0 = vpop.f32.mrb[53].mxu0  ;;  %v3009_v33 = vmul.f32 %v4470_v63, %v5828_v53 }
 0xbcb   :  { %v3008_v50 = vmul.f32 %v2673_v0, %v5828_v53 }
 0xbcd   :  { %4592 = vmatmul.mubr.msk.f32.vlgmr.msra.gmra.mrb[100].mxu1 %vm61_vm0, %v3275_v3  ;;  %v4473_v31 = vpop.f32.mrb[54].mxu0 }
 0xbce   :  { %4594 = vmatprep.mubr.msk.f32.mxu1 %vm61_vm0, %v3276_v51  ;;  %v3011_v4 = vmul.f32 %v4473_v31, %v5836_v52  ;;  %v2683_v7 = vpop.f32.mrb[55].mxu0 }
 0xbcf   :  { %v3010_v13 = vmul.f32 %v2683_v7, %v5836_v52 }
 0xbd0   :  { %v3019_v37 = vadd.f32 %v3011_v4, %v3003_v2 }
 0xbd1   :  { %4595 = vmatmul.mubr.msk.f32.gmra.mrb[102].mxu1 %vm61_vm0, %v3277_v6  ;;  %v3018_v39 = vadd.f32 %v3010_v13, %v3002_v61  ;;  %v4476_v40 = vpop.f32.mrb[56].mxu0 }
 0xbd2   :  { %4597 = vmatprep.mubr.msk.f32.mxu1 %vm61_vm0, %v3278_v56  ;;  %v3013_v57 = vmul.f32 %v4476_v40, %v5836_v52  ;;  %v2693_v41 = vpop.f32.mrb[57].mxu0 }
 0xbd3   :  { %v3012_v17 = vmul.f32 %v2693_v41, %v5836_v52 }
 0xbd4   :  { %v3021_v16 = vadd.f32 %v3013_v57, %v3005_v20 }
 0xbd5   :  { %4598 = vmatmul.mubr.msk.f32.gmra.mrb[104].mxu1 %vm61_vm0, %v3279_v18  ;;  %v3020_v28 = vadd.f32 %v3012_v17, %v3004_v5  ;;  %v4479_v9 = vpop.f32.mrb[58].mxu0 }
 0xbd6   :  { %4600 = vmatprep.mubr.msk.f32.mxu1 %vm61_vm0, %v3280_v22  ;;  %v3015_v12 = vmul.f32 %v4479_v9, %v5836_v52  ;;  %v2703_v36 = vpop.f32.mrb[59].mxu0 }
 0xbd7   :  { %v3014_v14 = vmul.f32 %v2703_v36, %v5836_v52 }
 0xbd8   :  { %v3023_v60 = vadd.f32 %v3015_v12, %v3007_v46 }
 0xbd9   :  { %4601 = vmatmul.mubr.msk.f32.gmra.mrb[106].mxu1 %vm61_vm0, %v3281_v30  ;;  %v3022_v15 = vadd.f32 %v3014_v14, %v3006_v49  ;;  %v4482_v48 = vpop.f32.mrb[60].mxu0 }
 0xbda   :  { %v3017_v44 = vmul.f32 %v4482_v48, %v5836_v52  ;;  %v2713_v55 = vpop.f32.mrb[61].mxu0 }
 0xbdb   :  { %v3016_v59 = vmul.f32 %v2713_v55, %v5836_v52 }
 0xbdc   :  { %v3025_v62 = vadd.f32 %v3017_v44, %v3009_v33 }
 0xbdd   :  { %v3024_v21 = vadd.f32 %v3016_v59, %v3008_v50  ;;  %v4485_v32 = vpop.f32.mrb[62].mxu0 }
 0xbde   :  { %v3027_v26 = vmul.f32 %v4485_v32, %v5857_v42  ;;  %v2723_v35 = vpop.f32.mrb[63].mxu0 }
 0xbdf   :  { %v3026_v1 = vmul.f32 %v2723_v35, %v5857_v42 }
 0xbe0   :  { %v3035_v23 = vadd.f32 %v3027_v26, %v3019_v37 }
 0xbe1   :  { %v3034_v10 = vadd.f32 %v3026_v1, %v3018_v39  ;;  %v4488_v24 = vpop.f32.mrb[64].mxu0 }
 0xbe2   :  { %v3029_v53 = vmul.f32 %v4488_v24, %v5857_v42  ;;  %v2733_v25 = vpop.f32.mrb[65].mxu0 }
 0xbe3   :  { %v3028_v11 = vmul.f32 %v2733_v25, %v5857_v42 }
 0xbe4   :  { %v3037_v38 = vadd.f32 %v3029_v53, %v3021_v16 }
 0xbe5   :  { %v3036_v45 = vadd.f32 %v3028_v11, %v3020_v28  ;;  %v4491_v47 = vpop.f32.mrb[66].mxu0 }
 0xbe6   :  { %v3031_v52 = vmul.f32 %v4491_v47, %v5857_v42  ;;  %v2743_v43 = vpop.f32.mrb[67].mxu0 }
 0xbe7   :  { %v3030_v8 = vmul.f32 %v2743_v43, %v5857_v42 }
 0xbe8   :  { %v3039_v63 = vadd.f32 %v3031_v52, %v3023_v60 }
 0xbe9   :  { %v3038_v0 = vadd.f32 %v3030_v8, %v3022_v15  ;;  %v4494_v3 = vpop.f32.mrb[68].mxu0 }
 0xbea   :  { %v3033_v51 = vmul.f32 %v4494_v3, %v5857_v42  ;;  %v2753_v2 = vpop.f32.mrb[69].mxu0 }
 0xbeb   :  { %v3032_v61 = vmul.f32 %v2753_v2, %v5857_v42 }
 0xbec   :  { %v3041_v31 = vadd.f32 %v3033_v51, %v3025_v62 }
 0xbed   :  { %v3040_v4 = vadd.f32 %v3032_v61, %v3024_v21  ;;  %v4497_v7 = vpop.f32.mrb[70].mxu0 }
 0xbee   :  { %v3043_v6 = vmul.f32 %v4497_v7, %v5869_v34  ;;  %v2763_v13 = vpop.f32.mrb[71].mxu0 }
 0xbef   :  { %v3042_v56 = vmul.f32 %v2763_v13, %v5869_v34 }
 0xbf0   :  { %v3051_v20 = vadd.f32 %v3043_v6, %v3035_v23 }
 0xbf1   :  { %v3050_v37 = vadd.f32 %v3042_v56, %v3034_v10  ;;  %v4500_v5 = vpop.f32.mrb[72].mxu0 }
 0xbf2   :  { %v3045_v39 = vmul.f32 %v4500_v5, %v5869_v34  ;;  %v2773_v40 = vpop.f32.mrb[73].mxu0 }
 0xbf3   :  { %v3044_v57 = vmul.f32 %v2773_v40, %v5869_v34 }
 0xbf4   :  { %v3053_v41 = vadd.f32 %v3045_v39, %v3037_v38 }
 0xbf5   :  { %v3052_v18 = vadd.f32 %v3044_v57, %v3036_v45  ;;  %v4503_v17 = vpop.f32.mrb[74].mxu0 }
 0xbf6   :  { %v3047_v42 = vmul.f32 %v4503_v17, %v5869_v34  ;;  %v2783_v22 = vpop.f32.mrb[75].mxu0 }
 0xbf7   :  { %v3046_v46 = vmul.f32 %v2783_v22, %v5869_v34 }
 0xbf8   :  { %v3055_v16 = vadd.f32 %v3047_v42, %v3039_v63 }
 0xbf9   :  { %v3054_v49 = vadd.f32 %v3046_v46, %v3038_v0  ;;  %v4506_v28 = vpop.f32.mrb[76].mxu0 }
 0xbfa   :  { %v3049_v9 = vmul.f32 %v4506_v28, %v5869_v34  ;;  %v2793_v12 = vpop.f32.mrb[77].mxu0 }
 0xbfb   :  { %v3048_v36 = vmul.f32 %v2793_v12, %v5869_v34 }
 0xbfc   :  { %v3057_v30 = vadd.f32 %v3049_v9, %v3041_v31 }
 0xbfd   :  { %v3056_v14 = vadd.f32 %v3048_v36, %v3040_v4  ;;  %v4509_v33 = vpop.f32.mrb[78].mxu0 }
 0xbfe   :  { %v3059_v60 = vmul.f32 %v4509_v33, %v5881_v29  ;;  %v2803_v50 = vpop.f32.mrb[79].mxu0 }
 0xbff   :  { %v3058_v15 = vmul.f32 %v2803_v50, %v5881_v29 }
 0xc00   :  { %v3067_v48 = vadd.f32 %v3059_v60, %v3051_v20 }
 0xc01   :  { %v3066_v44 = vadd.f32 %v3058_v15, %v3050_v37  ;;  %v4512_v55 = vpop.f32.mrb[80].mxu0 }
 0xc02   :  { %v3061_v59 = vmul.f32 %v4512_v55, %v5881_v29  ;;  %v2813_v62 = vpop.f32.mrb[81].mxu0 }
 0xc03   :  { %v3060_v21 = vmul.f32 %v2813_v62, %v5881_v29 }
 0xc04   :  { %v3069_v32 = vadd.f32 %v3061_v59, %v3053_v41 }
 0xc05   :  { %v3068_v26 = vadd.f32 %v3060_v21, %v3052_v18  ;;  %v4515_v35 = vpop.f32.mrb[82].mxu0 }
 0xc06   :  { %v3063_v34 = vmul.f32 %v4515_v35, %v5881_v29  ;;  %v2823_v1 = vpop.f32.mrb[83].mxu0 }
 0xc07   :  { %v3062_v23 = vmul.f32 %v2823_v1, %v5881_v29 }
 0xc08   :  { %v3071_v10 = vadd.f32 %v3063_v34, %v3055_v16 }
 0xc09   :  { %v3070_v24 = vadd.f32 %v3062_v23, %v3054_v49  ;;  %v4518_v53 = vpop.f32.mrb[84].mxu0 }
 0xc0a   :  { %v3065_v25 = vmul.f32 %v4518_v53, %v5881_v29  ;;  %v2833_v11 = vpop.f32.mrb[85].mxu0 }
 0xc0b   :  { %v3064_v38 = vmul.f32 %v2833_v11, %v5881_v29 }
 0xc0c   :  { %v3073_v45 = vadd.f32 %v3065_v25, %v3057_v30 }
 0xc0d   :  { %v3072_v47 = vadd.f32 %v3064_v38, %v3056_v14  ;;  %v4521_v52 = vpop.f32.mrb[86].mxu0 }
 0xc0e   :  { %v3075_v43 = vmul.f32 %v4521_v52, %v5893_v19  ;;  %v2843_v8 = vpop.f32.mrb[87].mxu0 }
 0xc0f   :  { %v3074_v63 = vmul.f32 %v2843_v8, %v5893_v19 }
 0xc10   :  { %v3083_v0 = vadd.f32 %v3075_v43, %v3067_v48 }
 0xc11   :  { %v3082_v3 = vadd.f32 %v3074_v63, %v3066_v44  ;;  %v4524_v51 = vpop.f32.mrb[88].mxu0 }
 0xc12   :  { %v3077_v2 = vmul.f32 %v4524_v51, %v5893_v19  ;;  %v2853_v61 = vpop.f32.mrb[89].mxu0 }
 0xc13   :  { %v3076_v31 = vmul.f32 %v2853_v61, %v5893_v19 }
 0xc14   :  { %v3085_v4 = vadd.f32 %v3077_v2, %v3069_v32 }
 0xc15   :  { %v3084_v7 = vadd.f32 %v3076_v31, %v3068_v26  ;;  %v4527_v6 = vpop.f32.mrb[90].mxu0 }
 0xc16   :  { %v3079_v29 = vmul.f32 %v4527_v6, %v5893_v19  ;;  %v2863_v13 = vpop.f32.mrb[91].mxu0 }
 0xc17   :  { %v3078_v56 = vmul.f32 %v2863_v13, %v5893_v19 }
 0xc18   :  { %v3087_v20 = vadd.f32 %v3079_v29, %v3071_v10 }
 0xc19   :  { %v3086_v37 = vadd.f32 %v3078_v56, %v3070_v24  ;;  %v4530_v5 = vpop.f32.mrb[92].mxu0 }
 0xc1a   :  { %v3081_v39 = vmul.f32 %v4530_v5, %v5893_v19  ;;  %v2873_v40 = vpop.f32.mrb[93].mxu0 }
 0xc1b   :  { %v3080_v57 = vmul.f32 %v2873_v40, %v5893_v19 }
 0xc1c   :  { %v3089_v41 = vadd.f32 %v3081_v39, %v3073_v45 }
 0xc1d   :  { %v3088_v18 = vadd.f32 %v3080_v57, %v3072_v47  ;;  %v4533_v17 = vpop.f32.mrb[94].mxu0 }
 0xc1e   :  { %v3091_v42 = vmul.f32 %v4533_v17, %v5905_v54  ;;  %v2883_v22 = vpop.f32.mrb[95].mxu0 }
 0xc1f   :  { %v3090_v46 = vmul.f32 %v2883_v22, %v5905_v54 }
 0xc20   :  { %v3099_v16 = vadd.f32 %v3091_v42, %v3083_v0 }
 0xc21   :  { %v3098_v49 = vadd.f32 %v3090_v46, %v3082_v3  ;;  %v4536_v28 = vpop.f32.mrb[96].mxu0 }
 0xc22   :  { %v3093_v9 = vmul.f32 %v4536_v28, %v5905_v54  ;;  %v2893_v12 = vpop.f32.mrb[97].mxu0 }
 0xc23   :  { %v3092_v36 = vmul.f32 %v2893_v12, %v5905_v54 }
 0xc24   :  { %v3101_v30 = vadd.f32 %v3093_v9, %v3085_v4 }
 0xc25   :  { %v3100_v14 = vadd.f32 %v3092_v36, %v3084_v7  ;;  %v4539_v33 = vpop.f32.mrb[98].mxu0  ;;  %v5052_v7 = vld [vmem:[%s6610_s8 + $0x8] ss:$0 sm:$0xff] }
 0xc26   :  { %v3095_v19 = vmul.f32 %v4539_v33, %v5905_v54  ;;  %v2903_v60 = vpop.f32.mrb[99].mxu0 }
 0xc27   :  { %v3094_v50 = vmul.f32 %v2903_v60, %v5905_v54 }
 0xc28   :  { %v3103_v15 = vadd.f32 %v3095_v19, %v3087_v20 }
 0xc29   :  { %v3102_v48 = vadd.f32 %v3094_v50, %v3086_v37  ;;  %v4542_v44 = vpop.f32.mrb[100].mxu0 }
 0xc2a   :  { %v3097_v55 = vmul.f32 %v4542_v44, %v5905_v54  ;;  %v2913_v59 = vpop.f32.mrb[101].mxu0 }
 0xc2b   :  { %v3096_v62 = vmul.f32 %v2913_v59, %v5905_v54 }
 0xc2c   :  { %v3105_v21 = vadd.f32 %v3097_v55, %v3089_v41 }
 0xc2d   :  { %v3104_v32 = vadd.f32 %v3096_v62, %v3088_v18  ;;  %v4545_v26 = vpop.f32.mrb[102].mxu0 }
 0xc2e   :  { %v3107_v35 = vmul.f32 %v4545_v26, %v5917_v27  ;;  %v2923_v34 = vpop.f32.mrb[103].mxu0 }
 0xc2f   :  { %v3106_v1 = vmul.f32 %v2923_v34, %v5917_v27 }
 0xc30   :  { %v3115_v23 = vadd.f32 %v3107_v35, %v3099_v16 }
 0xc31   :  { %v3114_v10 = vadd.f32 %v3106_v1, %v3098_v49  ;;  %v4548_v24 = vpop.f32.mrb[104].mxu0 }
 0xc32   :  { %v3109_v53 = vmul.f32 %v4548_v24, %v5917_v27  ;;  %v2933_v25 = vpop.f32.mrb[105].mxu0 }
 0xc33   :  { %v3108_v11 = vmul.f32 %v2933_v25, %v5917_v27  ;;  %v3756_v25 = vld [vmem:[%s6613_s11] ss:$0 sm:$0xff] }
 0xc34   :  { %v3117_v38 = vadd.f32 %v3109_v53, %v3101_v30 }
 0xc35   :  { %v3116_v45 = vadd.f32 %v3108_v11, %v3100_v14  ;;  %v4551_v47 = vpop.f32.mrb[106].mxu0 }
 0xc36   :  { %v3111_v54 = vmul.f32 %v4551_v47, %v5917_v27  ;;  %v2943_v52 = vpop.f32.mrb[107].mxu0 }
 0xc37   :  { %v3110_v43 = vmul.f32 %v2943_v52, %v5917_v27 }
 0xc38   :  { %v3119_v8 = vadd.f32 %v3111_v54, %v3103_v15 }
 0xc39   :  { %v3118_v63 = vadd.f32 %v3110_v43, %v3102_v48  ;;  %v4554_v0 = vpop.f32.mrb[108].mxu0 }
 0xc3a   :  { %v3113_v3 = vmul.f32 %v4554_v0, %v5917_v27  ;;  %v2953_v51 = vpop.f32.mrb[109].mxu0 }
 0xc3b   :  { %v3112_v2 = vmul.f32 %v2953_v51, %v5917_v27 }
 0xc3c   :  { %v3121_v61 = vadd.f32 %v3113_v3, %v3105_v21 }
 0xc3d   :  { %v3120_v31 = vadd.f32 %v3112_v2, %v3104_v32  ;;  %v4557_v4 = vpop.f32.mrb[110].mxu0 }
 0xc3e   :  { %v3123_v6 = vmul.f32 %v5052_v7, %v4557_v4  ;;  %v2963_v29 = vpop.f32.mrb[111].mxu0 }
 0xc3f   :  { %v3122_v13 = vmul.f32 %v5052_v7, %v2963_v29 }
 0xc40   :  { %v3131_v56 = vadd.f32 %v3123_v6, %v3115_v23 }
 0xc41   :  { %v4560_v20 = vpop.f32.mrb[112].mxu0  ;;  %v3130_v37 = vadd.f32 %v3122_v13, %v3114_v10 }
 0xc42   :  { %v3125_v5 = vmul.f32 %v5052_v7, %v4560_v20  ;;  %v2973_v39 = vpop.f32.mrb[113].mxu0 }
 0xc43   :  { %v3124_v40 = vmul.f32 %v5052_v7, %v2973_v39 }
 0xc44   :  { %v3133_v57 = vadd.f32 %v3125_v5, %v3117_v38 }
 0xc45   :  { %v4563_v41 = vpop.f32.mrb[114].mxu0  ;;  %v3132_v18 = vadd.f32 %v3124_v40, %v3116_v45 }
 0xc46   :  { %v3127_v27 = vmul.f32 %v5052_v7, %v4563_v41  ;;  %v2983_v17 = vpop.f32.mrb[115].mxu0 }
 0xc47   :  { %v3126_v42 = vmul.f32 %v5052_v7, %v2983_v17 }
 0xc48   :  { %v3135_v22 = vadd.f32 %v3127_v27, %v3119_v8 }
 0xc49   :  { %v4566_v46 = vpop.f32.mrb[116].mxu0  ;;  %v3134_v16 = vadd.f32 %v3126_v42, %v3118_v63 }
 0xc4a   :  { %v3129_v49 = vmul.f32 %v5052_v7, %v4566_v46  ;;  %v2993_v28 = vpop.f32.mrb[117].mxu0 }
 0xc4b   :  { %v3128_v9 = vmul.f32 %v5052_v7, %v2993_v28 }
 0xc4c   :  { %v3137_v12 = vadd.f32 %v3129_v49, %v3121_v61 }
 0xc4d   :  { %v3136_v36 = vadd.f32 %v3128_v9, %v3120_v31 }
 0xc8c   :  { %v4573_v30 = vpop.f32.mrb[118].mxu0 }
 0xc8d   :  { %v3234_v14 = vadd.f32 %v4573_v30, %v3131_v56  ;;  %v3228_v33 = vpop.f32.mrb[119].mxu0 }
 0xc8e   :  { %v3229_v19 = vadd.f32 %v3228_v33, %v3130_v37 }
 0xc8f   :  { %v3283_v50 = vadd.f32 %v6421_v58, %v3234_v14 }
 0xc90   :  { %v3282_v60 = vadd.f32 %v6421_v58, %v3229_v19 }
 0xc92   :  { %4603 = vmatprep.mubr.msk.f32.mxu1 %vm61_vm0, %v3282_v60 }
 0xc93   :  { %4604 = vmatmul.mubr.msk.f32.gmra.mrb[108].mxu1 %vm61_vm0, %v3283_v50 }
 0xc94   :  { %v4576_v15 = vpop.f32.mrb[94].mxu1 }
 0xc95   :  { %v3244_v48 = vadd.f32 %v4576_v15, %v3133_v57  ;;  %v3238_v44 = vpop.f32.mrb[95].mxu1 }
 0xc96   :  { %v3239_v55 = vadd.f32 %v3238_v44, %v3132_v18 }
 0xc97   :  { %v3285_v21 = vadd.f32 %v6421_v58, %v3244_v48 }
 0xc98   :  { %v3284_v59 = vadd.f32 %v6421_v58, %v3239_v55  ;;  %v4579_v62 = vpop.f32.mrb[96].mxu1 }
 0xc99   :  { %v3254_v32 = vadd.f32 %v4579_v62, %v3135_v22  ;;  %v3248_v26 = vpop.f32.mrb[97].mxu1 }
 0xc9a   :  { %v3249_v35 = vadd.f32 %v3248_v26, %v3134_v16  ;;  %4606 = vmatprep.mubr.msk.f32.mxu1 %vm61_vm0, %v3284_v59 }
 0xc9b   :  { %4607 = vmatmul.mubr.msk.f32.gmra.mrb[110].mxu1 %vm61_vm0, %v3285_v21  ;;  %v3287_v23 = vadd.f32 %v6421_v58, %v3254_v32 }
 0xc9c   :  { %v3286_v34 = vadd.f32 %v6421_v58, %v3249_v35  ;;  %v4582_v1 = vpop.f32.mrb[98].mxu1 }
 0xc9d   :  { %v3264_v10 = vadd.f32 %v4582_v1, %v3137_v12  ;;  %v3258_v24 = vpop.f32.mrb[99].mxu1 }
 0xc9e   :  { %v3259_v53 = vadd.f32 %v3258_v24, %v3136_v36  ;;  %4609 = vmatprep.mubr.msk.f32.mxu1 %vm61_vm0, %v3286_v34 }
 0xc9f   :  { %4610 = vmatmul.mubr.msk.f32.gmra.mrb[112].mxu1 %vm61_vm0, %v3287_v23  ;;  %v3289_v45 = vadd.f32 %v6421_v58, %v3264_v10 }
 0xca0   :  { %v3288_v11 = vadd.f32 %v6421_v58, %v3259_v53  ;;  %v4593_v38 = vpop.f32.mrb[100].mxu1 }
 0xca1   :  { %v3421_v47 = vadd.f32 %v4593_v38, %v3756_v25  ;;  %v3415_v54 = vpop.f32.mrb[101].mxu1 }
 0xca2   :  { %v3416_v52 = vadd.f32 %v3756_v25, %v3415_v54  ;;  %4612 = vmatprep.mubr.msk.f32.mxu1 %vm61_vm0, %v3288_v11 }
 0xca3   :  { %3495 = vst.msk [vmem:[%s6614_s12 + $0x8] sm:$0xff] %vm61_vm0, %v3421_v47  ;;  %4613 = vmatmul.mubr.msk.f32.gmra.mrb[114].mxu1 %vm61_vm0, %v3289_v45 }
 0xca4   :  { %3494 = vst.msk [vmem:[%s6614_s12] sm:$0xff] %vm61_vm0, %v3416_v52  ;;  %v4596_v43 = vpop.f32.mrb[102].mxu1 }
 0xca5   :  { %v3431_v8 = vadd.f32 %v4596_v43, %v3756_v25  ;;  %v3425_v58 = vpop.f32.mrb[103].mxu1 }
 0xca6   :  { %v3426_v63 = vadd.f32 %v3756_v25, %v3425_v58 }
 0xca7   :  { %3497 = vst.msk [vmem:[%s6614_s12 + $0x18] sm:$0xff] %vm61_vm0, %v3431_v8 }
 0xca8   :  { %3496 = vst.msk [vmem:[%s6614_s12 + $0x10] sm:$0xff] %vm61_vm0, %v3426_v63  ;;  %v4599_v0 = vpop.f32.mrb[104].mxu1 }
 0xca9   :  { %v3441_v3 = vadd.f32 %v4599_v0, %v3756_v25  ;;  %v3435_v51 = vpop.f32.mrb[105].mxu1 }
 0xcaa   :  { %v3436_v2 = vadd.f32 %v3756_v25, %v3435_v51 }
 0xcab   :  { %3499 = vst.msk [vmem:[%s6614_s12 + $0x28] sm:$0xff] %vm61_vm0, %v3441_v3 }
 0xcac   :  { %3498 = vst.msk [vmem:[%s6614_s12 + $0x20] sm:$0xff] %vm61_vm0, %v3436_v2  ;;  %v4602_v61 = vpop.f32.mrb[106].mxu1 }
 0xcad   :  { %v3451_v31 = vadd.f32 %v4602_v61, %v3756_v25  ;;  %v3445_v4 = vpop.f32.mrb[107].mxu1 }
 0xcae   :  { %v3446_v7 = vadd.f32 %v3756_v25, %v3445_v4 }
 0xcaf   :  { %3501 = vst.msk [vmem:[%s6614_s12 + $0x38] sm:$0xff] %vm61_vm0, %v3451_v31 }
 0xcb0   :  { %3500 = vst.msk [vmem:[%s6614_s12 + $0x30] sm:$0xff] %vm61_vm0, %v3446_v7 }
 0xd66   :  { %v4605_v6 = vpop.f32.mrb[108].mxu1 }
 0xd67   :  { %v3461_v29 = vadd.f32 %v4605_v6, %v3756_v25  ;;  %v3455_v13 = vpop.f32.mrb[109].mxu1 }
 0xd68   :  { %v3456_v56 = vadd.f32 %v3756_v25, %v3455_v13 }
 0xd69   :  { %3503 = vst.msk [vmem:[%s6614_s12 + $0x48] sm:$0xff] %vm61_vm0, %v3461_v29 }
 0xd6a   :  { %3502 = vst.msk [vmem:[%s6614_s12 + $0x40] sm:$0xff] %vm61_vm0, %v3456_v56 }
 0xd6e   :  { %v4608_v20 = vpop.f32.mrb[110].mxu1 }
 0xd6f   :  { %v3471_v37 = vadd.f32 %v4608_v20, %v3756_v25  ;;  %v3465_v5 = vpop.f32.mrb[111].mxu1 }
 0xd70   :  { %v3466_v39 = vadd.f32 %v3756_v25, %v3465_v5 }
 0xd71   :  { %3505 = vst.msk [vmem:[%s6614_s12 + $0x58] sm:$0xff] %vm61_vm0, %v3471_v37 }
 0xd72   :  { %3504 = vst.msk [vmem:[%s6614_s12 + $0x50] sm:$0xff] %vm61_vm0, %v3466_v39  ;;  %v4611_v40 = vpop.f32.mrb[112].mxu1 }
 0xd73   :  { %v3481_v57 = vadd.f32 %v4611_v40, %v3756_v25  ;;  %v3475_v41 = vpop.f32.mrb[113].mxu1 }
 0xd74   :  { %v3476_v18 = vadd.f32 %v3756_v25, %v3475_v41 }
 0xd75   :  { %3507 = vst.msk [vmem:[%s6614_s12 + $0x68] sm:$0xff] %vm61_vm0, %v3481_v57 }
 0xd76   :  { %3506 = vst.msk [vmem:[%s6614_s12 + $0x60] sm:$0xff] %vm61_vm0, %v3476_v18  ;;  %v4614_v27 = vpop.f32.mrb[114].mxu1 }
 0xd77   :  { %v3491_v17 = vadd.f32 %v4614_v27, %v3756_v25  ;;  %v3485_v42 = vpop.f32.mrb[115].mxu1 }
 0xd78   :  { %v3486_v22 = vadd.f32 %v3756_v25, %v3485_v42 }
 0xd79   :  { %3509 = vst.msk [vmem:[%s6614_s12 + $0x78] sm:$0xff] %vm61_vm0, %v3491_v17 }
 0xd7a   :  { %3508 = vst.msk [vmem:[%s6614_s12 + $0x70] sm:$0xff] %vm61_vm0, %v3486_v22 }

</bundles_post_ra>
